<compile_context>
chip_gen: v7x
topology: tpu7x:2x2x1
jax: 0.10.0
libtpu: 0.0.40
codegen_flags: <defaults>
</compile_context>

<pallas_src>
import functools

import numpy as np
import jax
import jax.numpy as jnp
from jax.experimental import pallas as pl
from jax.experimental.pallas import tpu as pltpu

LRELU_SLOPE = 0.2
OUT_LANES = 128          # lane-dense output block; wrapper slices to (N, 1)
_PAD = 8                 # sublane-aligned row padding of the conv scratch


def _full_spec(shape):
    # Whole-array block (all operands here are tiny; full-extent blocks are legal).
    return pl.BlockSpec(shape, lambda: (0,) * len(shape))


def _leaky(x):
    # one vmul + one vmax (instead of compare+select)
    return jnp.maximum(x, LRELU_SLOPE * x)


def _tap_masks(n, h, w):
    """Static per-(row, tap) validity masks for a 3x3 / pad=1 conv on an
    NHWC-row-flattened feature map of shape (n*h*w, C). Computed with numpy at
    trace time and passed as a tiny constant input (avoids in-kernel int div)."""
    hw = h * w
    m = np.zeros((n * hw, 9), np.float32)
    for r in range(n * hw):
        hh = (r % hw) // w
        ww = r % w
        for kh in range(3):
            for kw in range(3):
                if 0 <= hh + (kh - 1) < h and 0 <= ww + (kw - 1) < w:
                    m[r, kh * 3 + kw] = 1.0
    return jnp.asarray(m)


# ---------------------------------------------------------------------------
# Single fused kernel: fRGB(1x1)+LReLU -> MinibatchStd -> conv3x3+LReLU
#                      -> conv3x3+LReLU -> Linear(16*ls, 1)
# ---------------------------------------------------------------------------
def _d_fused_kernel(x_ref, masks_ref, w_rgb_ref, b_rgb_ref, w1_ref, b1_ref,
                    w2_ref, b2_ref, w_lin_ref, b_lin_ref, o_ref, pad_ref,
                    *, n, h, w, ls):
    hw = h * w
    nhw = n * hw

    # ---- fRGB: 1x1 conv (3 -> ls) as 3 broadcast FMAs on the VPU + LeakyReLU ----
    x = x_ref[...]                                            # (nhw, 3)
    y = (x[:, 0:1] * w_rgb_ref[0:1, :]
         + x[:, 1:2] * w_rgb_ref[1:2, :]
         + x[:, 2:3] * w_rgb_ref[2:3, :]
         + b_rgb_ref[...])
    y = _leaky(y)                                             # (nhw, ls)

    # ---- Minibatch std scalar: batch reduction via static row-block slices ----
    mean_b = y[0:hw, :]
    for b in range(1, n):
        mean_b = mean_b + y[b * hw:(b + 1) * hw, :]
    mean_b = mean_b * (1.0 / n)
    var = (y[0:hw, :] - mean_b) ** 2
    for b in range(1, n):
        var = var + (y[b * hw:(b + 1) * hw, :] - mean_b) ** 2
    var = var * (1.0 / (n - 1))                               # unbiased (torch.std)
    s = jnp.mean(jnp.sqrt(var), keepdims=True)                # (1, 1)

    masks = masks_ref[...]                                    # (nhw, 9)

    def conv3x3(w_ref_l, cin, bias_row, use_std):
        # 3x3 / pad=1 conv as 9 accumulated small dots over shifted row slices
        # of the zero-padded VMEM scratch.  The constant minibatch-std channel
        # (when present) is added analytically: (mask * s) * w_row.
        acc = bias_row + jnp.zeros((nhw, ls), jnp.float32)
        for t in range(9):
            d = (t // 3 - 1) * w + (t % 3 - 1)                # static row shift
            vm = masks[:, t:t + 1]                            # (nhw, 1)
            tap = pad_ref[_PAD + d:_PAD + d + nhw, :] * vm    # (nhw, ls)
            acc = acc + jnp.dot(tap, w_ref_l[t * cin:t * cin + ls, :],
                                preferred_element_type=jnp.float32)
            if use_std:
                acc = acc + (vm * s) * w_ref_l[t * cin + ls:(t + 1) * cin, :]
        return _leaky(acc)

    # zero the row-padded scratch once; border rows stay zero for both convs
    pad_ref[...] = jnp.zeros_like(pad_ref)

    # ---- econv1: 3x3, (ls+1) -> ls, pad 1, + LeakyReLU ----
    pad_ref[_PAD:_PAD + nhw, :] = y
    y1 = conv3x3(w1_ref, ls + 1, b1_ref[...], use_std=True)   # (nhw, ls)

    # ---- econv2: 3x3, ls -> ls, pad 1, + LeakyReLU ----
    pad_ref[_PAD:_PAD + nhw, :] = y1
    y2 = conv3x3(w2_ref, ls, b2_ref[...], use_std=False)      # (nhw, ls)

    # ---- Linear(16*ls -> 1) as a per-batch weighted reduction (no MXU) ----
    w_lin = w_lin_ref[...]                                    # (hw, ls) NHWC order
    ridx = jax.lax.broadcasted_iota(jnp.int32, (n, 1), 0)
    out_col = jnp.zeros((n, 1), jnp.float32)
    for b in range(n):
        v = jnp.sum(y2[b * hw:(b + 1) * hw, :] * w_lin, keepdims=True)  # (1, 1)
        out_col = out_col + jnp.where(ridx == b, v, 0.0)
    out_col = out_col + b_lin_ref[...]                        # (n, 1)

    # single lane-dense store; wrapper slices [:, :1]
    o_ref[...] = jnp.broadcast_to(out_col, (n, o_ref.shape[1]))


# ---------------------------------------------------------------------------
# Wrapper: one pallas_call for the whole forward.  x is NCHW like PyTorch.
# ---------------------------------------------------------------------------
def d_forward(x_nchw, params, *, ls):
    n, cin, h, w = x_nchw.shape
    assert cin == 3 and n >= 2 and (w + 1) <= _PAD
    hw = h * w

    x_pix = jnp.transpose(x_nchw, (0, 2, 3, 1)).reshape(n * hw, 3)   # NHWC rows
    masks = _tap_masks(n, h, w)                                      # (n*hw, 9)

    args = (x_pix, masks,
            params["w_rgb"], params["b_rgb"], params["w1"], params["b1"],
            params["w2"], params["b2"], params["w_lin"], params["b_lin"])

    out_pad = pl.pallas_call(
        functools.partial(_d_fused_kernel, n=n, h=h, w=w, ls=ls),
        out_shape=jax.ShapeDtypeStruct((n, OUT_LANES), jnp.float32),
        in_specs=[_full_spec(a.shape) for a in args],
        out_specs=_full_spec((n, OUT_LANES)),
        scratch_shapes=[pltpu.VMEM((n * hw + 2 * _PAD, ls), jnp.float32)],
    )(*args)
    return out_pad[:, :1]                                            # (N, 1)


# ---------------------------------------------------------------------------
# Deterministic parameter construction (synthetic init, matches module shapes).
# ---------------------------------------------------------------------------
def make_params(key, ls):
    k_rgb, k1, k2, k_lin = jax.random.split(key, 4)

    # fRGB: EqualizedLR_Conv2d(3, ls, 1x1) — weight N(0,1), scale sqrt(2/fan_in)
    w_rgb_t = jax.random.normal(k_rgb, (ls, 3, 1, 1), jnp.float32)
    w_rgb = (w_rgb_t * jnp.sqrt(2.0 / 3.0)).reshape(ls, 3).T          # (3, ls)
    b_rgb = jnp.zeros((1, ls), jnp.float32)

    # econv1: EqualizedLR_Conv2d(ls+1, ls, 3x3), pad 1; rows = (kh, kw, cin)
    cin1 = ls + 1
    w1_t = jax.random.normal(k1, (ls, cin1, 3, 3), jnp.float32)
    w1 = (w1_t * jnp.sqrt(2.0 / (cin1 * 9))).transpose(2, 3, 1, 0).reshape(9 * cin1, ls)
    b1 = jnp.zeros((1, ls), jnp.float32)

    # econv2: EqualizedLR_Conv2d(ls, ls, 3x3), pad 1; bias init normal then zeros -> zeros
    w2_t = jax.random.normal(k2, (ls, ls, 3, 3), jnp.float32)
    w2 = (w2_t * jnp.sqrt(2.0 / (ls * 9))).transpose(2, 3, 1, 0).reshape(9 * ls, ls)
    b2 = jnp.zeros((1, ls), jnp.float32)

    # lin: nn.Linear(16*ls, 1).  Torch flattens NCHW (c,h,w); permute to (h*w, c)
    # so the same mapping holds for the kernel's NHWC-row-ordered y2.
    w_lin_t = 0.1 * jax.random.normal(k_lin, (1, 16 * ls), jnp.float32)
    w_lin = w_lin_t.reshape(ls, 4, 4).transpose(1, 2, 0).reshape(16, ls)   # (hw, ls)
    b_lin = jnp.zeros((1, 1), jnp.float32)

    return dict(w_rgb=w_rgb, b_rgb=b_rgb, w1=w1, b1=b1, w2=w2, b2=b2,
                w_lin=w_lin, b_lin=b_lin)


if __name__ == "__main__":
    ls = 8           # channel width "ls" of D
    N = 2            # batch (>= 2 so the unbiased minibatch-std is well-defined)
    H = W = 4        # Linear(16*ls, 1) implies a 4x4 spatial input at depth=1

    key = jax.random.PRNGKey(0)
    k_x, k_p = jax.random.split(key)
    x = jax.random.normal(k_x, (N, 3, H, W), jnp.float32)   # NCHW like PyTorch
    params = make_params(k_p, ls)

    out = jax.jit(functools.partial(d_forward, ls=ls))(x, params)
    out = jax.block_until_ready(out)
    assert out.shape == (N, 1), out.shape
    assert bool(jnp.all(jnp.isfinite(out)))
    print("KERNEL_OK")
</pallas_src>

<mosaic_0001>
module attributes {stable_mosaic.version = 11 : i64} {
  func.func @_d_fused_kernel(%arg0: memref<32x3xf32, #tpu.memory_space<vmem>>, %arg1: memref<32x9xf32, #tpu.memory_space<vmem>>, %arg2: memref<3x8xf32, #tpu.memory_space<vmem>>, %arg3: memref<1x8xf32, #tpu.memory_space<vmem>>, %arg4: memref<81x8xf32, #tpu.memory_space<vmem>>, %arg5: memref<1x8xf32, #tpu.memory_space<vmem>>, %arg6: memref<72x8xf32, #tpu.memory_space<vmem>>, %arg7: memref<1x8xf32, #tpu.memory_space<vmem>>, %arg8: memref<16x8xf32, #tpu.memory_space<vmem>>, %arg9: memref<1x1xf32, #tpu.memory_space<vmem>>, %arg10: memref<2x128xf32, #tpu.memory_space<vmem>>, %arg11: memref<48x8xf32, #tpu.memory_space<vmem>>) attributes {dimension_semantics = [], scalar_prefetch = 0 : i64, scratch_operands = 1 : i64, tpu.core_type = #tpu.core_type<tc>} {
    %c0 = arith.constant 0 : index
    %c0_0 = arith.constant 0 : index
    %0 = vector.load %arg0[%c0, %c0_0] : memref<32x3xf32, #tpu.memory_space<vmem>>, vector<32x3xf32>
    %1 = vector.extract_strided_slice %0 {offsets = [0, 0], sizes = [32, 1], strides = [1, 1]} : vector<32x3xf32> to vector<32x1xf32>
    %c0_1 = arith.constant 0 : index
    %c0_2 = arith.constant 0 : index
    %2 = vector.load %arg2[%c0_1, %c0_2] : memref<3x8xf32, #tpu.memory_space<vmem>>, vector<1x8xf32>
    %3 = vector.broadcast %1 : vector<32x1xf32> to vector<32x8xf32>
    %4 = vector.broadcast %2 : vector<1x8xf32> to vector<32x8xf32>
    %5 = arith.mulf %3, %4 : vector<32x8xf32>
    %6 = vector.extract_strided_slice %0 {offsets = [0, 1], sizes = [32, 1], strides = [1, 1]} : vector<32x3xf32> to vector<32x1xf32>
    %c1 = arith.constant 1 : index
    %c0_3 = arith.constant 0 : index
    %7 = vector.load %arg2[%c1, %c0_3] : memref<3x8xf32, #tpu.memory_space<vmem>>, vector<1x8xf32>
    %8 = vector.broadcast %6 : vector<32x1xf32> to vector<32x8xf32>
    %9 = vector.broadcast %7 : vector<1x8xf32> to vector<32x8xf32>
    %10 = arith.mulf %8, %9 : vector<32x8xf32>
    %11 = arith.addf %5, %10 : vector<32x8xf32>
    %12 = vector.extract_strided_slice %0 {offsets = [0, 2], sizes = [32, 1], strides = [1, 1]} : vector<32x3xf32> to vector<32x1xf32>
    %c2 = arith.constant 2 : index
    %c0_4 = arith.constant 0 : index
    %13 = vector.load %arg2[%c2, %c0_4] : memref<3x8xf32, #tpu.memory_space<vmem>>, vector<1x8xf32>
    %14 = vector.broadcast %12 : vector<32x1xf32> to vector<32x8xf32>
    %15 = vector.broadcast %13 : vector<1x8xf32> to vector<32x8xf32>
    %16 = arith.mulf %14, %15 : vector<32x8xf32>
    %17 = arith.addf %11, %16 : vector<32x8xf32>
    %c0_5 = arith.constant 0 : index
    %c0_6 = arith.constant 0 : index
    %18 = vector.load %arg3[%c0_5, %c0_6] : memref<1x8xf32, #tpu.memory_space<vmem>>, vector<1x8xf32>
    %19 = vector.broadcast %18 : vector<1x8xf32> to vector<32x8xf32>
    %20 = arith.addf %17, %19 : vector<32x8xf32>
    %cst = arith.constant 2.000000e-01 : f32
    %21 = vector.broadcast %cst : f32 to vector<32x8xf32>
    %22 = arith.mulf %21, %20 : vector<32x8xf32>
    %23 = arith.maximumf %20, %22 : vector<32x8xf32>
    %24 = vector.extract_strided_slice %23 {offsets = [0, 0], sizes = [16, 8], strides = [1, 1]} : vector<32x8xf32> to vector<16x8xf32>
    %25 = vector.extract_strided_slice %23 {offsets = [16, 0], sizes = [16, 8], strides = [1, 1]} : vector<32x8xf32> to vector<16x8xf32>
    %26 = arith.addf %24, %25 : vector<16x8xf32>
    %cst_7 = arith.constant 5.000000e-01 : f32
    %27 = vector.broadcast %cst_7 : f32 to vector<16x8xf32>
    %28 = arith.mulf %26, %27 : vector<16x8xf32>
    %29 = vector.extract_strided_slice %23 {offsets = [0, 0], sizes = [16, 8], strides = [1, 1]} : vector<32x8xf32> to vector<16x8xf32>
    %30 = arith.subf %29, %28 : vector<16x8xf32>
    %31 = arith.mulf %30, %30 : vector<16x8xf32>
    %32 = vector.extract_strided_slice %23 {offsets = [16, 0], sizes = [16, 8], strides = [1, 1]} : vector<32x8xf32> to vector<16x8xf32>
    %33 = arith.subf %32, %28 : vector<16x8xf32>
    %34 = arith.mulf %33, %33 : vector<16x8xf32>
    %35 = arith.addf %31, %34 : vector<16x8xf32>
    %cst_8 = arith.constant 1.000000e+00 : f32
    %36 = vector.broadcast %cst_8 : f32 to vector<16x8xf32>
    %37 = arith.mulf %35, %36 : vector<16x8xf32>
    %38 = math.sqrt %37 : vector<16x8xf32>
    %39 = vector.shape_cast %38 : vector<16x8xf32> to vector<1x16x8xf32>
    %cst_9 = arith.constant dense<0.000000e+00> : vector<1xf32>
    %40 = vector.multi_reduction <add>, %39, %cst_9 [1, 2] : vector<1x16x8xf32> to vector<1xf32>
    %41 = vector.shape_cast %40 : vector<1xf32> to vector<1x1x1xf32>
    %42 = vector.extract %41[0, 0, 0] : f32 from vector<1x1x1xf32>
    %43 = vector.broadcast %42 : f32 to vector<1x1xf32>
    %cst_10 = arith.constant 1.280000e+02 : f32
    %44 = vector.broadcast %cst_10 : f32 to vector<1x1xf32>
    %45 = arith.divf %43, %44 : vector<1x1xf32>
    %c0_11 = arith.constant 0 : index
    %c0_12 = arith.constant 0 : index
    %46 = vector.load %arg1[%c0_11, %c0_12] : memref<32x9xf32, #tpu.memory_space<vmem>>, vector<32x9xf32>
    %cst_13 = arith.constant 0.000000e+00 : f32
    %47 = vector.broadcast %cst_13 : f32 to vector<48x8xf32>
    %c0_14 = arith.constant 0 : index
    %c0_15 = arith.constant 0 : index
    %48 = vector.load %arg11[%c0_14, %c0_15] : memref<48x8xf32, #tpu.memory_space<vmem>>, vector<48x8xf32>
    tpu.vector_store %arg11[%c0_14, %c0_15], %47 {strides = array<i32>} : memref<48x8xf32, #tpu.memory_space<vmem>>, vector<48x8xf32>,
    %c8 = arith.constant 8 : index
    %c0_16 = arith.constant 0 : index
    %49 = vector.load %arg11[%c8, %c0_16] : memref<48x8xf32, #tpu.memory_space<vmem>>, vector<32x8xf32>
    tpu.vector_store %arg11[%c8, %c0_16], %23 {strides = array<i32>} : memref<48x8xf32, #tpu.memory_space<vmem>>, vector<32x8xf32>,
    %c0_17 = arith.constant 0 : index
    %c0_18 = arith.constant 0 : index
    %50 = vector.load %arg5[%c0_17, %c0_18] : memref<1x8xf32, #tpu.memory_space<vmem>>, vector<1x8xf32>
    %cst_19 = arith.constant 0.000000e+00 : f32
    %51 = vector.broadcast %cst_19 : f32 to vector<32x8xf32>
    %52 = vector.broadcast %50 : vector<1x8xf32> to vector<32x8xf32>
    %53 = arith.addf %52, %51 : vector<32x8xf32>
    %54 = vector.extract_strided_slice %46 {offsets = [0, 0], sizes = [32, 1], strides = [1, 1]} : vector<32x9xf32> to vector<32x1xf32>
    %c3 = arith.constant 3 : index
    %c0_20 = arith.constant 0 : index
    %55 = vector.load %arg11[%c3, %c0_20] : memref<48x8xf32, #tpu.memory_space<vmem>>, vector<32x8xf32>
    %56 = vector.broadcast %54 : vector<32x1xf32> to vector<32x8xf32>
    %57 = arith.mulf %55, %56 : vector<32x8xf32>
    %c0_21 = arith.constant 0 : index
    %c0_22 = arith.constant 0 : index
    %58 = vector.load %arg4[%c0_21, %c0_22] : memref<81x8xf32, #tpu.memory_space<vmem>>, vector<8x8xf32>
    %cst_23 = arith.constant dense<0.000000e+00> : vector<32x8xf32>
    %59 = tpu.matmul %57, %58, %cst_23 {dimension_numbers = #tpu.dot_dimension_numbers<[1], [0], [0], [1], [0, 0, 1, 1], [], []>} : vector<32x8xf32>, vector<8x8xf32>, vector<32x8xf32> -> vector<32x8xf32>
    %60 = arith.addf %53, %59 : vector<32x8xf32>
    %61 = vector.broadcast %45 : vector<1x1xf32> to vector<32x1xf32>
    %62 = arith.mulf %54, %61 : vector<32x1xf32>
    %c8_24 = arith.constant 8 : index
    %c0_25 = arith.constant 0 : index
    %63 = vector.load %arg4[%c8_24, %c0_25] : memref<81x8xf32, #tpu.memory_space<vmem>>, vector<1x8xf32>
    %64 = vector.broadcast %62 : vector<32x1xf32> to vector<32x8xf32>
    %65 = vector.broadcast %63 : vector<1x8xf32> to vector<32x8xf32>
    %66 = arith.mulf %64, %65 : vector<32x8xf32>
    %67 = arith.addf %60, %66 : vector<32x8xf32>
    %68 = vector.extract_strided_slice %46 {offsets = [0, 1], sizes = [32, 1], strides = [1, 1]} : vector<32x9xf32> to vector<32x1xf32>
    %c4 = arith.constant 4 : index
    %c0_26 = arith.constant 0 : index
    %69 = vector.load %arg11[%c4, %c0_26] : memref<48x8xf32, #tpu.memory_space<vmem>>, vector<32x8xf32>
    %70 = vector.broadcast %68 : vector<32x1xf32> to vector<32x8xf32>
    %71 = arith.mulf %69, %70 : vector<32x8xf32>
    %c9 = arith.constant 9 : index
    %c0_27 = arith.constant 0 : index
    %72 = vector.load %arg4[%c9, %c0_27] : memref<81x8xf32, #tpu.memory_space<vmem>>, vector<8x8xf32>
    %cst_28 = arith.constant dense<0.000000e+00> : vector<32x8xf32>
    %73 = tpu.matmul %71, %72, %cst_28 {dimension_numbers = #tpu.dot_dimension_numbers<[1], [0], [0], [1], [0, 0, 1, 1], [], []>} : vector<32x8xf32>, vector<8x8xf32>, vector<32x8xf32> -> vector<32x8xf32>
    %74 = arith.addf %67, %73 : vector<32x8xf32>
    %75 = vector.broadcast %45 : vector<1x1xf32> to vector<32x1xf32>
    %76 = arith.mulf %68, %75 : vector<32x1xf32>
    %c17 = arith.constant 17 : index
    %c0_29 = arith.constant 0 : index
    %77 = vector.load %arg4[%c17, %c0_29] : memref<81x8xf32, #tpu.memory_space<vmem>>, vector<1x8xf32>
    %78 = vector.broadcast %76 : vector<32x1xf32> to vector<32x8xf32>
    %79 = vector.broadcast %77 : vector<1x8xf32> to vector<32x8xf32>
    %80 = arith.mulf %78, %79 : vector<32x8xf32>
    %81 = arith.addf %74, %80 : vector<32x8xf32>
    %82 = vector.extract_strided_slice %46 {offsets = [0, 2], sizes = [32, 1], strides = [1, 1]} : vector<32x9xf32> to vector<32x1xf32>
    %c5 = arith.constant 5 : index
    %c0_30 = arith.constant 0 : index
    %83 = vector.load %arg11[%c5, %c0_30] : memref<48x8xf32, #tpu.memory_space<vmem>>, vector<32x8xf32>
    %84 = vector.broadcast %82 : vector<32x1xf32> to vector<32x8xf32>
    %85 = arith.mulf %83, %84 : vector<32x8xf32>
    %c18 = arith.constant 18 : index
    %c0_31 = arith.constant 0 : index
    %86 = vector.load %arg4[%c18, %c0_31] : memref<81x8xf32, #tpu.memory_space<vmem>>, vector<8x8xf32>
    %cst_32 = arith.constant dense<0.000000e+00> : vector<32x8xf32>
    %87 = tpu.matmul %85, %86, %cst_32 {dimension_numbers = #tpu.dot_dimension_numbers<[1], [0], [0], [1], [0, 0, 1, 1], [], []>} : vector<32x8xf32>, vector<8x8xf32>, vector<32x8xf32> -> vector<32x8xf32>
    %88 = arith.addf %81, %87 : vector<32x8xf32>
    %89 = vector.broadcast %45 : vector<1x1xf32> to vector<32x1xf32>
    %90 = arith.mulf %82, %89 : vector<32x1xf32>
    %c26 = arith.constant 26 : index
    %c0_33 = arith.constant 0 : index
    %91 = vector.load %arg4[%c26, %c0_33] : memref<81x8xf32, #tpu.memory_space<vmem>>, vector<1x8xf32>
    %92 = vector.broadcast %90 : vector<32x1xf32> to vector<32x8xf32>
    %93 = vector.broadcast %91 : vector<1x8xf32> to vector<32x8xf32>
    %94 = arith.mulf %92, %93 : vector<32x8xf32>
    %95 = arith.addf %88, %94 : vector<32x8xf32>
    %96 = vector.extract_strided_slice %46 {offsets = [0, 3], sizes = [32, 1], strides = [1, 1]} : vector<32x9xf32> to vector<32x1xf32>
    %c7 = arith.constant 7 : index
    %c0_34 = arith.constant 0 : index
    %97 = vector.load %arg11[%c7, %c0_34] : memref<48x8xf32, #tpu.memory_space<vmem>>, vector<32x8xf32>
    %98 = vector.broadcast %96 : vector<32x1xf32> to vector<32x8xf32>
    %99 = arith.mulf %97, %98 : vector<32x8xf32>
    %c27 = arith.constant 27 : index
    %c0_35 = arith.constant 0 : index
    %100 = vector.load %arg4[%c27, %c0_35] : memref<81x8xf32, #tpu.memory_space<vmem>>, vector<8x8xf32>
    %cst_36 = arith.constant dense<0.000000e+00> : vector<32x8xf32>
    %101 = tpu.matmul %99, %100, %cst_36 {dimension_numbers = #tpu.dot_dimension_numbers<[1], [0], [0], [1], [0, 0, 1, 1], [], []>} : vector<32x8xf32>, vector<8x8xf32>, vector<32x8xf32> -> vector<32x8xf32>
    %102 = arith.addf %95, %101 : vector<32x8xf32>
    %103 = vector.broadcast %45 : vector<1x1xf32> to vector<32x1xf32>
    %104 = arith.mulf %96, %103 : vector<32x1xf32>
    %c35 = arith.constant 35 : index
    %c0_37 = arith.constant 0 : index
    %105 = vector.load %arg4[%c35, %c0_37] : memref<81x8xf32, #tpu.memory_space<vmem>>, vector<1x8xf32>
    %106 = vector.broadcast %104 : vector<32x1xf32> to vector<32x8xf32>
    %107 = vector.broadcast %105 : vector<1x8xf32> to vector<32x8xf32>
    %108 = arith.mulf %106, %107 : vector<32x8xf32>
    %109 = arith.addf %102, %108 : vector<32x8xf32>
    %110 = vector.extract_strided_slice %46 {offsets = [0, 4], sizes = [32, 1], strides = [1, 1]} : vector<32x9xf32> to vector<32x1xf32>
    %c8_38 = arith.constant 8 : index
    %c0_39 = arith.constant 0 : index
    %111 = vector.load %arg11[%c8_38, %c0_39] : memref<48x8xf32, #tpu.memory_space<vmem>>, vector<32x8xf32>
    %112 = vector.broadcast %110 : vector<32x1xf32> to vector<32x8xf32>
    %113 = arith.mulf %111, %112 : vector<32x8xf32>
    %c36 = arith.constant 36 : index
    %c0_40 = arith.constant 0 : index
    %114 = vector.load %arg4[%c36, %c0_40] : memref<81x8xf32, #tpu.memory_space<vmem>>, vector<8x8xf32>
    %cst_41 = arith.constant dense<0.000000e+00> : vector<32x8xf32>
    %115 = tpu.matmul %113, %114, %cst_41 {dimension_numbers = #tpu.dot_dimension_numbers<[1], [0], [0], [1], [0, 0, 1, 1], [], []>} : vector<32x8xf32>, vector<8x8xf32>, vector<32x8xf32> -> vector<32x8xf32>
    %116 = arith.addf %109, %115 : vector<32x8xf32>
    %117 = vector.broadcast %45 : vector<1x1xf32> to vector<32x1xf32>
    %118 = arith.mulf %110, %117 : vector<32x1xf32>
    %c44 = arith.constant 44 : index
    %c0_42 = arith.constant 0 : index
    %119 = vector.load %arg4[%c44, %c0_42] : memref<81x8xf32, #tpu.memory_space<vmem>>, vector<1x8xf32>
    %120 = vector.broadcast %118 : vector<32x1xf32> to vector<32x8xf32>
    %121 = vector.broadcast %119 : vector<1x8xf32> to vector<32x8xf32>
    %122 = arith.mulf %120, %121 : vector<32x8xf32>
    %123 = arith.addf %116, %122 : vector<32x8xf32>
    %124 = vector.extract_strided_slice %46 {offsets = [0, 5], sizes = [32, 1], strides = [1, 1]} : vector<32x9xf32> to vector<32x1xf32>
    %c9_43 = arith.constant 9 : index
    %c0_44 = arith.constant 0 : index
    %125 = vector.load %arg11[%c9_43, %c0_44] : memref<48x8xf32, #tpu.memory_space<vmem>>, vector<32x8xf32>
    %126 = vector.broadcast %124 : vector<32x1xf32> to vector<32x8xf32>
    %127 = arith.mulf %125, %126 : vector<32x8xf32>
    %c45 = arith.constant 45 : index
    %c0_45 = arith.constant 0 : index
    %128 = vector.load %arg4[%c45, %c0_45] : memref<81x8xf32, #tpu.memory_space<vmem>>, vector<8x8xf32>
    %cst_46 = arith.constant dense<0.000000e+00> : vector<32x8xf32>
    %129 = tpu.matmul %127, %128, %cst_46 {dimension_numbers = #tpu.dot_dimension_numbers<[1], [0], [0], [1], [0, 0, 1, 1], [], []>} : vector<32x8xf32>, vector<8x8xf32>, vector<32x8xf32> -> vector<32x8xf32>
    %130 = arith.addf %123, %129 : vector<32x8xf32>
    %131 = vector.broadcast %45 : vector<1x1xf32> to vector<32x1xf32>
    %132 = arith.mulf %124, %131 : vector<32x1xf32>
    %c53 = arith.constant 53 : index
    %c0_47 = arith.constant 0 : index
    %133 = vector.load %arg4[%c53, %c0_47] : memref<81x8xf32, #tpu.memory_space<vmem>>, vector<1x8xf32>
    %134 = vector.broadcast %132 : vector<32x1xf32> to vector<32x8xf32>
    %135 = vector.broadcast %133 : vector<1x8xf32> to vector<32x8xf32>
    %136 = arith.mulf %134, %135 : vector<32x8xf32>
    %137 = arith.addf %130, %136 : vector<32x8xf32>
    %138 = vector.extract_strided_slice %46 {offsets = [0, 6], sizes = [32, 1], strides = [1, 1]} : vector<32x9xf32> to vector<32x1xf32>
    %c11 = arith.constant 11 : index
    %c0_48 = arith.constant 0 : index
    %139 = vector.load %arg11[%c11, %c0_48] : memref<48x8xf32, #tpu.memory_space<vmem>>, vector<32x8xf32>
    %140 = vector.broadcast %138 : vector<32x1xf32> to vector<32x8xf32>
    %141 = arith.mulf %139, %140 : vector<32x8xf32>
    %c54 = arith.constant 54 : index
    %c0_49 = arith.constant 0 : index
    %142 = vector.load %arg4[%c54, %c0_49] : memref<81x8xf32, #tpu.memory_space<vmem>>, vector<8x8xf32>
    %cst_50 = arith.constant dense<0.000000e+00> : vector<32x8xf32>
    %143 = tpu.matmul %141, %142, %cst_50 {dimension_numbers = #tpu.dot_dimension_numbers<[1], [0], [0], [1], [0, 0, 1, 1], [], []>} : vector<32x8xf32>, vector<8x8xf32>, vector<32x8xf32> -> vector<32x8xf32>
    %144 = arith.addf %137, %143 : vector<32x8xf32>
    %145 = vector.broadcast %45 : vector<1x1xf32> to vector<32x1xf32>
    %146 = arith.mulf %138, %145 : vector<32x1xf32>
    %c62 = arith.constant 62 : index
    %c0_51 = arith.constant 0 : index
    %147 = vector.load %arg4[%c62, %c0_51] : memref<81x8xf32, #tpu.memory_space<vmem>>, vector<1x8xf32>
    %148 = vector.broadcast %146 : vector<32x1xf32> to vector<32x8xf32>
    %149 = vector.broadcast %147 : vector<1x8xf32> to vector<32x8xf32>
    %150 = arith.mulf %148, %149 : vector<32x8xf32>
    %151 = arith.addf %144, %150 : vector<32x8xf32>
    %152 = vector.extract_strided_slice %46 {offsets = [0, 7], sizes = [32, 1], strides = [1, 1]} : vector<32x9xf32> to vector<32x1xf32>
    %c12 = arith.constant 12 : index
    %c0_52 = arith.constant 0 : index
    %153 = vector.load %arg11[%c12, %c0_52] : memref<48x8xf32, #tpu.memory_space<vmem>>, vector<32x8xf32>
    %154 = vector.broadcast %152 : vector<32x1xf32> to vector<32x8xf32>
    %155 = arith.mulf %153, %154 : vector<32x8xf32>
    %c63 = arith.constant 63 : index
    %c0_53 = arith.constant 0 : index
    %156 = vector.load %arg4[%c63, %c0_53] : memref<81x8xf32, #tpu.memory_space<vmem>>, vector<8x8xf32>
    %cst_54 = arith.constant dense<0.000000e+00> : vector<32x8xf32>
    %157 = tpu.matmul %155, %156, %cst_54 {dimension_numbers = #tpu.dot_dimension_numbers<[1], [0], [0], [1], [0, 0, 1, 1], [], []>} : vector<32x8xf32>, vector<8x8xf32>, vector<32x8xf32> -> vector<32x8xf32>
    %158 = arith.addf %151, %157 : vector<32x8xf32>
    %159 = vector.broadcast %45 : vector<1x1xf32> to vector<32x1xf32>
    %160 = arith.mulf %152, %159 : vector<32x1xf32>
    %c71 = arith.constant 71 : index
    %c0_55 = arith.constant 0 : index
    %161 = vector.load %arg4[%c71, %c0_55] : memref<81x8xf32, #tpu.memory_space<vmem>>, vector<1x8xf32>
    %162 = vector.broadcast %160 : vector<32x1xf32> to vector<32x8xf32>
    %163 = vector.broadcast %161 : vector<1x8xf32> to vector<32x8xf32>
    %164 = arith.mulf %162, %163 : vector<32x8xf32>
    %165 = arith.addf %158, %164 : vector<32x8xf32>
    %166 = vector.extract_strided_slice %46 {offsets = [0, 8], sizes = [32, 1], strides = [1, 1]} : vector<32x9xf32> to vector<32x1xf32>
    %c13 = arith.constant 13 : index
    %c0_56 = arith.constant 0 : index
    %167 = vector.load %arg11[%c13, %c0_56] : memref<48x8xf32, #tpu.memory_space<vmem>>, vector<32x8xf32>
    %168 = vector.broadcast %166 : vector<32x1xf32> to vector<32x8xf32>
    %169 = arith.mulf %167, %168 : vector<32x8xf32>
    %c72 = arith.constant 72 : index
    %c0_57 = arith.constant 0 : index
    %170 = vector.load %arg4[%c72, %c0_57] : memref<81x8xf32, #tpu.memory_space<vmem>>, vector<8x8xf32>
    %cst_58 = arith.constant dense<0.000000e+00> : vector<32x8xf32>
    %171 = tpu.matmul %169, %170, %cst_58 {dimension_numbers = #tpu.dot_dimension_numbers<[1], [0], [0], [1], [0, 0, 1, 1], [], []>} : vector<32x8xf32>, vector<8x8xf32>, vector<32x8xf32> -> vector<32x8xf32>
    %172 = arith.addf %165, %171 : vector<32x8xf32>
    %173 = vector.broadcast %45 : vector<1x1xf32> to vector<32x1xf32>
    %174 = arith.mulf %166, %173 : vector<32x1xf32>
    %c80 = arith.constant 80 : index
    %c0_59 = arith.constant 0 : index
    %175 = vector.load %arg4[%c80, %c0_59] : memref<81x8xf32, #tpu.memory_space<vmem>>, vector<1x8xf32>
    %176 = vector.broadcast %174 : vector<32x1xf32> to vector<32x8xf32>
    %177 = vector.broadcast %175 : vector<1x8xf32> to vector<32x8xf32>
    %178 = arith.mulf %176, %177 : vector<32x8xf32>
    %179 = arith.addf %172, %178 : vector<32x8xf32>
    %cst_60 = arith.constant 2.000000e-01 : f32
    %180 = vector.broadcast %cst_60 : f32 to vector<32x8xf32>
    %181 = arith.mulf %180, %179 : vector<32x8xf32>
    %182 = arith.maximumf %179, %181 : vector<32x8xf32>
    %c8_61 = arith.constant 8 : index
    %c0_62 = arith.constant 0 : index
    %183 = vector.load %arg11[%c8_61, %c0_62] : memref<48x8xf32, #tpu.memory_space<vmem>>, vector<32x8xf32>
    tpu.vector_store %arg11[%c8_61, %c0_62], %182 {strides = array<i32>} : memref<48x8xf32, #tpu.memory_space<vmem>>, vector<32x8xf32>,
    %c0_63 = arith.constant 0 : index
    %c0_64 = arith.constant 0 : index
    %184 = vector.load %arg7[%c0_63, %c0_64] : memref<1x8xf32, #tpu.memory_space<vmem>>, vector<1x8xf32>
    %cst_65 = arith.constant 0.000000e+00 : f32
    %185 = vector.broadcast %cst_65 : f32 to vector<32x8xf32>
    %186 = vector.broadcast %184 : vector<1x8xf32> to vector<32x8xf32>
    %187 = arith.addf %186, %185 : vector<32x8xf32>
    %188 = vector.extract_strided_slice %46 {offsets = [0, 0], sizes = [32, 1], strides = [1, 1]} : vector<32x9xf32> to vector<32x1xf32>
    %c3_66 = arith.constant 3 : index
    %c0_67 = arith.constant 0 : index
    %189 = vector.load %arg11[%c3_66, %c0_67] : memref<48x8xf32, #tpu.memory_space<vmem>>, vector<32x8xf32>
    %190 = vector.broadcast %188 : vector<32x1xf32> to vector<32x8xf32>
    %191 = arith.mulf %189, %190 : vector<32x8xf32>
    %c0_68 = arith.constant 0 : index
    %c0_69 = arith.constant 0 : index
    %192 = vector.load %arg6[%c0_68, %c0_69] : memref<72x8xf32, #tpu.memory_space<vmem>>, vector<8x8xf32>
    %cst_70 = arith.constant dense<0.000000e+00> : vector<32x8xf32>
    %193 = tpu.matmul %191, %192, %cst_70 {dimension_numbers = #tpu.dot_dimension_numbers<[1], [0], [0], [1], [0, 0, 1, 1], [], []>} : vector<32x8xf32>, vector<8x8xf32>, vector<32x8xf32> -> vector<32x8xf32>
    %194 = arith.addf %187, %193 : vector<32x8xf32>
    %195 = vector.extract_strided_slice %46 {offsets = [0, 1], sizes = [32, 1], strides = [1, 1]} : vector<32x9xf32> to vector<32x1xf32>
    %c4_71 = arith.constant 4 : index
    %c0_72 = arith.constant 0 : index
    %196 = vector.load %arg11[%c4_71, %c0_72] : memref<48x8xf32, #tpu.memory_space<vmem>>, vector<32x8xf32>
    %197 = vector.broadcast %195 : vector<32x1xf32> to vector<32x8xf32>
    %198 = arith.mulf %196, %197 : vector<32x8xf32>
    %c8_73 = arith.constant 8 : index
    %c0_74 = arith.constant 0 : index
    %199 = vector.load %arg6[%c8_73, %c0_74] : memref<72x8xf32, #tpu.memory_space<vmem>>, vector<8x8xf32>
    %cst_75 = arith.constant dense<0.000000e+00> : vector<32x8xf32>
    %200 = tpu.matmul %198, %199, %cst_75 {dimension_numbers = #tpu.dot_dimension_numbers<[1], [0], [0], [1], [0, 0, 1, 1], [], []>} : vector<32x8xf32>, vector<8x8xf32>, vector<32x8xf32> -> vector<32x8xf32>
    %201 = arith.addf %194, %200 : vector<32x8xf32>
    %202 = vector.extract_strided_slice %46 {offsets = [0, 2], sizes = [32, 1], strides = [1, 1]} : vector<32x9xf32> to vector<32x1xf32>
    %c5_76 = arith.constant 5 : index
    %c0_77 = arith.constant 0 : index
    %203 = vector.load %arg11[%c5_76, %c0_77] : memref<48x8xf32, #tpu.memory_space<vmem>>, vector<32x8xf32>
    %204 = vector.broadcast %202 : vector<32x1xf32> to vector<32x8xf32>
    %205 = arith.mulf %203, %204 : vector<32x8xf32>
    %c16 = arith.constant 16 : index
    %c0_78 = arith.constant 0 : index
    %206 = vector.load %arg6[%c16, %c0_78] : memref<72x8xf32, #tpu.memory_space<vmem>>, vector<8x8xf32>
    %cst_79 = arith.constant dense<0.000000e+00> : vector<32x8xf32>
    %207 = tpu.matmul %205, %206, %cst_79 {dimension_numbers = #tpu.dot_dimension_numbers<[1], [0], [0], [1], [0, 0, 1, 1], [], []>} : vector<32x8xf32>, vector<8x8xf32>, vector<32x8xf32> -> vector<32x8xf32>
    %208 = arith.addf %201, %207 : vector<32x8xf32>
    %209 = vector.extract_strided_slice %46 {offsets = [0, 3], sizes = [32, 1], strides = [1, 1]} : vector<32x9xf32> to vector<32x1xf32>
    %c7_80 = arith.constant 7 : index
    %c0_81 = arith.constant 0 : index
    %210 = vector.load %arg11[%c7_80, %c0_81] : memref<48x8xf32, #tpu.memory_space<vmem>>, vector<32x8xf32>
    %211 = vector.broadcast %209 : vector<32x1xf32> to vector<32x8xf32>
    %212 = arith.mulf %210, %211 : vector<32x8xf32>
    %c24 = arith.constant 24 : index
    %c0_82 = arith.constant 0 : index
    %213 = vector.load %arg6[%c24, %c0_82] : memref<72x8xf32, #tpu.memory_space<vmem>>, vector<8x8xf32>
    %cst_83 = arith.constant dense<0.000000e+00> : vector<32x8xf32>
    %214 = tpu.matmul %212, %213, %cst_83 {dimension_numbers = #tpu.dot_dimension_numbers<[1], [0], [0], [1], [0, 0, 1, 1], [], []>} : vector<32x8xf32>, vector<8x8xf32>, vector<32x8xf32> -> vector<32x8xf32>
    %215 = arith.addf %208, %214 : vector<32x8xf32>
    %216 = vector.extract_strided_slice %46 {offsets = [0, 4], sizes = [32, 1], strides = [1, 1]} : vector<32x9xf32> to vector<32x1xf32>
    %c8_84 = arith.constant 8 : index
    %c0_85 = arith.constant 0 : index
    %217 = vector.load %arg11[%c8_84, %c0_85] : memref<48x8xf32, #tpu.memory_space<vmem>>, vector<32x8xf32>
    %218 = vector.broadcast %216 : vector<32x1xf32> to vector<32x8xf32>
    %219 = arith.mulf %217, %218 : vector<32x8xf32>
    %c32 = arith.constant 32 : index
    %c0_86 = arith.constant 0 : index
    %220 = vector.load %arg6[%c32, %c0_86] : memref<72x8xf32, #tpu.memory_space<vmem>>, vector<8x8xf32>
    %cst_87 = arith.constant dense<0.000000e+00> : vector<32x8xf32>
    %221 = tpu.matmul %219, %220, %cst_87 {dimension_numbers = #tpu.dot_dimension_numbers<[1], [0], [0], [1], [0, 0, 1, 1], [], []>} : vector<32x8xf32>, vector<8x8xf32>, vector<32x8xf32> -> vector<32x8xf32>
    %222 = arith.addf %215, %221 : vector<32x8xf32>
    %223 = vector.extract_strided_slice %46 {offsets = [0, 5], sizes = [32, 1], strides = [1, 1]} : vector<32x9xf32> to vector<32x1xf32>
    %c9_88 = arith.constant 9 : index
    %c0_89 = arith.constant 0 : index
    %224 = vector.load %arg11[%c9_88, %c0_89] : memref<48x8xf32, #tpu.memory_space<vmem>>, vector<32x8xf32>
    %225 = vector.broadcast %223 : vector<32x1xf32> to vector<32x8xf32>
    %226 = arith.mulf %224, %225 : vector<32x8xf32>
    %c40 = arith.constant 40 : index
    %c0_90 = arith.constant 0 : index
    %227 = vector.load %arg6[%c40, %c0_90] : memref<72x8xf32, #tpu.memory_space<vmem>>, vector<8x8xf32>
    %cst_91 = arith.constant dense<0.000000e+00> : vector<32x8xf32>
    %228 = tpu.matmul %226, %227, %cst_91 {dimension_numbers = #tpu.dot_dimension_numbers<[1], [0], [0], [1], [0, 0, 1, 1], [], []>} : vector<32x8xf32>, vector<8x8xf32>, vector<32x8xf32> -> vector<32x8xf32>
    %229 = arith.addf %222, %228 : vector<32x8xf32>
    %230 = vector.extract_strided_slice %46 {offsets = [0, 6], sizes = [32, 1], strides = [1, 1]} : vector<32x9xf32> to vector<32x1xf32>
    %c11_92 = arith.constant 11 : index
    %c0_93 = arith.constant 0 : index
    %231 = vector.load %arg11[%c11_92, %c0_93] : memref<48x8xf32, #tpu.memory_space<vmem>>, vector<32x8xf32>
    %232 = vector.broadcast %230 : vector<32x1xf32> to vector<32x8xf32>
    %233 = arith.mulf %231, %232 : vector<32x8xf32>
    %c48 = arith.constant 48 : index
    %c0_94 = arith.constant 0 : index
    %234 = vector.load %arg6[%c48, %c0_94] : memref<72x8xf32, #tpu.memory_space<vmem>>, vector<8x8xf32>
    %cst_95 = arith.constant dense<0.000000e+00> : vector<32x8xf32>
    %235 = tpu.matmul %233, %234, %cst_95 {dimension_numbers = #tpu.dot_dimension_numbers<[1], [0], [0], [1], [0, 0, 1, 1], [], []>} : vector<32x8xf32>, vector<8x8xf32>, vector<32x8xf32> -> vector<32x8xf32>
    %236 = arith.addf %229, %235 : vector<32x8xf32>
    %237 = vector.extract_strided_slice %46 {offsets = [0, 7], sizes = [32, 1], strides = [1, 1]} : vector<32x9xf32> to vector<32x1xf32>
    %c12_96 = arith.constant 12 : index
    %c0_97 = arith.constant 0 : index
    %238 = vector.load %arg11[%c12_96, %c0_97] : memref<48x8xf32, #tpu.memory_space<vmem>>, vector<32x8xf32>
    %239 = vector.broadcast %237 : vector<32x1xf32> to vector<32x8xf32>
    %240 = arith.mulf %238, %239 : vector<32x8xf32>
    %c56 = arith.constant 56 : index
    %c0_98 = arith.constant 0 : index
    %241 = vector.load %arg6[%c56, %c0_98] : memref<72x8xf32, #tpu.memory_space<vmem>>, vector<8x8xf32>
    %cst_99 = arith.constant dense<0.000000e+00> : vector<32x8xf32>
    %242 = tpu.matmul %240, %241, %cst_99 {dimension_numbers = #tpu.dot_dimension_numbers<[1], [0], [0], [1], [0, 0, 1, 1], [], []>} : vector<32x8xf32>, vector<8x8xf32>, vector<32x8xf32> -> vector<32x8xf32>
    %243 = arith.addf %236, %242 : vector<32x8xf32>
    %244 = vector.extract_strided_slice %46 {offsets = [0, 8], sizes = [32, 1], strides = [1, 1]} : vector<32x9xf32> to vector<32x1xf32>
    %c13_100 = arith.constant 13 : index
    %c0_101 = arith.constant 0 : index
    %245 = vector.load %arg11[%c13_100, %c0_101] : memref<48x8xf32, #tpu.memory_space<vmem>>, vector<32x8xf32>
    %246 = vector.broadcast %244 : vector<32x1xf32> to vector<32x8xf32>
    %247 = arith.mulf %245, %246 : vector<32x8xf32>
    %c64 = arith.constant 64 : index
    %c0_102 = arith.constant 0 : index
    %248 = vector.load %arg6[%c64, %c0_102] : memref<72x8xf32, #tpu.memory_space<vmem>>, vector<8x8xf32>
    %cst_103 = arith.constant dense<0.000000e+00> : vector<32x8xf32>
    %249 = tpu.matmul %247, %248, %cst_103 {dimension_numbers = #tpu.dot_dimension_numbers<[1], [0], [0], [1], [0, 0, 1, 1], [], []>} : vector<32x8xf32>, vector<8x8xf32>, vector<32x8xf32> -> vector<32x8xf32>
    %250 = arith.addf %243, %249 : vector<32x8xf32>
    %cst_104 = arith.constant 2.000000e-01 : f32
    %251 = vector.broadcast %cst_104 : f32 to vector<32x8xf32>
    %252 = arith.mulf %251, %250 : vector<32x8xf32>
    %253 = arith.maximumf %250, %252 : vector<32x8xf32>
    %c0_105 = arith.constant 0 : index
    %c0_106 = arith.constant 0 : index
    %254 = vector.load %arg8[%c0_105, %c0_106] : memref<16x8xf32, #tpu.memory_space<vmem>>, vector<16x8xf32>
    %255 = tpu.iota {dimensions = array<i32: 0>} : vector<2x1xi32>
    %cst_107 = arith.constant 0.000000e+00 : f32
    %256 = vector.broadcast %cst_107 : f32 to vector<2x1xf32>
    %257 = vector.extract_strided_slice %253 {offsets = [0, 0], sizes = [16, 8], strides = [1, 1]} : vector<32x8xf32> to vector<16x8xf32>
    %258 = arith.mulf %257, %254 : vector<16x8xf32>
    %259 = vector.shape_cast %258 : vector<16x8xf32> to vector<1x16x8xf32>
    %cst_108 = arith.constant dense<0.000000e+00> : vector<1xf32>
    %260 = vector.multi_reduction <add>, %259, %cst_108 [1, 2] : vector<1x16x8xf32> to vector<1xf32>
    %261 = vector.shape_cast %260 : vector<1xf32> to vector<1x1x1xf32>
    %262 = vector.extract %261[0, 0, 0] : f32 from vector<1x1x1xf32>
    %263 = vector.broadcast %262 : f32 to vector<1x1xf32>
    %c0_i32 = arith.constant 0 : i32
    %264 = vector.broadcast %c0_i32 : i32 to vector<2x1xi32>
    %265 = arith.cmpi eq, %255, %264 : vector<2x1xi32>
    %cst_109 = arith.constant 0.000000e+00 : f32
    %266 = vector.shape_cast %263 : vector<1x1xf32> to vector<1x1xf32>
    %267 = vector.broadcast %266 : vector<1x1xf32> to vector<2x1xf32>
    %268 = vector.broadcast %cst_109 : f32 to vector<2x1xf32>
    %269 = arith.select %265, %267, %268 : vector<2x1xi1>, vector<2x1xf32>
    %270 = arith.addf %256, %269 : vector<2x1xf32>
    %271 = vector.extract_strided_slice %253 {offsets = [16, 0], sizes = [16, 8], strides = [1, 1]} : vector<32x8xf32> to vector<16x8xf32>
    %272 = arith.mulf %271, %254 : vector<16x8xf32>
    %273 = vector.shape_cast %272 : vector<16x8xf32> to vector<1x16x8xf32>
    %cst_110 = arith.constant dense<0.000000e+00> : vector<1xf32>
    %274 = vector.multi_reduction <add>, %273, %cst_110 [1, 2] : vector<1x16x8xf32> to vector<1xf32>
    %275 = vector.shape_cast %274 : vector<1xf32> to vector<1x1x1xf32>
    %276 = vector.extract %275[0, 0, 0] : f32 from vector<1x1x1xf32>
    %277 = vector.broadcast %276 : f32 to vector<1x1xf32>
    %c1_i32 = arith.constant 1 : i32
    %278 = vector.broadcast %c1_i32 : i32 to vector<2x1xi32>
    %279 = arith.cmpi eq, %255, %278 : vector<2x1xi32>
    %cst_111 = arith.constant 0.000000e+00 : f32
    %280 = vector.shape_cast %277 : vector<1x1xf32> to vector<1x1xf32>
    %281 = vector.broadcast %280 : vector<1x1xf32> to vector<2x1xf32>
    %282 = vector.broadcast %cst_111 : f32 to vector<2x1xf32>
    %283 = arith.select %279, %281, %282 : vector<2x1xi1>, vector<2x1xf32>
    %284 = arith.addf %270, %283 : vector<2x1xf32>
    %c0_112 = arith.constant 0 : index
    %c0_113 = arith.constant 0 : index
    %285 = vector.load %arg9[%c0_112, %c0_113] : memref<1x1xf32, #tpu.memory_space<vmem>>, vector<1x1xf32>
    %286 = vector.broadcast %285 : vector<1x1xf32> to vector<2x1xf32>
    %287 = arith.addf %284, %286 : vector<2x1xf32>
    %288 = vector.shape_cast %287 : vector<2x1xf32> to vector<2x1xf32>
    %289 = vector.broadcast %288 : vector<2x1xf32> to vector<2x128xf32>
    %c0_114 = arith.constant 0 : index
    %c0_115 = arith.constant 0 : index
    %290 = vector.load %arg10[%c0_114, %c0_115] : memref<2x128xf32, #tpu.memory_space<vmem>>, vector<2x128xf32>
    tpu.vector_store %arg10[%c0_114, %c0_115], %289 {strides = array<i32>} : memref<2x128xf32, #tpu.memory_space<vmem>>, vector<2x128xf32>,
    return
  }
}

</mosaic_0001>

<bundles_post_ra>
// kernel: d_forward.1
= control target key start
LH: loop header
LB: loop body
LE: loop exit
PB: predicated region body
PF: predicated region fallthrough
CT: control target
= control target key end

     0   :  { %v3193_v0 = vmov 1   ;;  %v3194_v1 = vmov 0   ;;  %v3195_v4 = vmov 2   ;;  %vm175_vm0 = vcmask 64512   ;;  %s3823_s0 = inlined_call_operand.vmem [shape: f32[32,3], index: 0, kind: input, shape index: {}]   ;;  %s3824_s1 = inlined_call_operand.vmem [shape: f32[32,9], index: 1, kind: input, shape index: {}]   ;;  %s3825_s4 = inlined_call_operand.vmem [shape: f32[81,8], index: 4, kind: input, shape index: {}]   ;;  %s3826_s2 = inlined_call_operand.vmem [shape: f32[3,8], index: 2, kind: input, shape index: {}]   ;;  %s3827_s3 = inlined_call_operand.vmem [shape: f32[1,8], index: 3, kind: input, shape index: {}]   ;;  %s3828_s6 = inlined_call_operand.vmem [shape: f32[72,8], index: 6, kind: input, shape index: {}]   ;;  %s3829_s5 = inlined_call_operand.vmem [shape: f32[1,8], index: 5, kind: input, shape index: {}]   ;;  %s3830_s7 = inlined_call_operand.vmem [shape: f32[1,8], index: 7, kind: input, shape index: {}]   ;;  %s3831_s8 = inlined_call_operand.vmem [shape: f32[16,8], index: 8, kind: input, shape index: {}]   ;;  %s3832_s9 = inlined_call_operand.<no memory space> [shape: f32[1,1], index: 9, kind: input, shape index: {}]   ;;  %s3833_s10 = inlined_call_operand.vmem [shape: f32[2,128], index: 10, kind: output, shape index: {}]  }
   0x1   :  { %3138 = vset.pattern.permute.xlu0 %v3193_v0  ;;  %3139 = vset.pattern.permute.xlu1 %v3194_v1  ;;  %v38_v2 = vld [vmem:[%s3823_s0 + $0x8] sm:$0xff]  ;;  %v37_v3 = vld [vmem:[%s3823_s0] sm:$0xff]  ;;  %v40_v5 = vld [vmem:[%s3823_s0 + $0x18] sm:$0xff]  ;;  %v3196_v6 = vmov 0.0   ;;  %v3197_v13 = vmov 3   ;;  %v3198_v14 = vmov 4  }
   0x2   :  { %49 = vperm.xlu1 %3139, %v38_v2   ;;  %72 = vperm.xlu0 %3138, %v37_v3   ;;  %197 = vst.msk [vmem:[#allocation2 + $0x10] sm:$0xff] %vm175_vm0, %v3196_v6  ;;  %195 = vst.msk [vmem:[#allocation2] sm:$0xff] %vm175_vm0, %v3196_v6  ;;  %v39_v7 = vld [vmem:[%s3823_s0 + $0x10] sm:$0xff]  ;;  %v3293_v9 = vld [vmem:[%s3824_s1 + $0x8] sm:$0xff]  ;;  %v3199_v16 = vmov 5   ;;  %v3200_v17 = vmov 6  }
   0x3   :  { %196 = vst.msk [vmem:[#allocation2 + $0x8] sm:$0xff] %vm175_vm0, %v3196_v6  ;;  %198 = vst.msk [vmem:[#allocation2 + $0x18] sm:$0xff] %vm175_vm0, %v3196_v6  ;;  %v3287_v8 = vld [vmem:[%s3824_s1 + $0x10] sm:$0xff]  ;;  %v3301_v10 = vld [vmem:[%s3824_s1] sm:$0xff]  ;;  %v3201_v18 = vmov 7   ;;  %v3202_v19 = vmov 8  }
   0x4   :  { %199 = vst.msk [vmem:[#allocation2 + $0x20] sm:$0xff] %vm175_vm0, %v3196_v6  ;;  %200 = vst.msk [vmem:[#allocation2 + $0x28] sm:$0xff] %vm175_vm0, %v3196_v6  ;;  %v3309_v11 = vld [vmem:[%s3824_s1 + $0x18] sm:$0xff]  ;;  %v241_v12 = vld [vmem:[%s3825_s4] sm:$0xff] }
   0x5   :  { %2874 = vmatprep.subr.mxu0 %v241_v12  ;;  %v3329_v15 = vld [vmem:[%s3825_s4 + $0x9] sm:$0xff]  ;;  %v2696_v22 = vld [vmem:[%s3826_s2] ss:$0 sm:$0xff]  ;;  %v2697_v23 = vld [vmem:[%s3826_s2 + $0x1] ss:$0 sm:$0xff] }
   0x6   :  { %3140 = vset.pattern.permute.xlu1 %v3193_v0  ;;  %3142 = vset.pattern.permute.xlu0 %v3195_v4  ;;  %v2698_v24 = vld [vmem:[%s3826_s2 + $0x2] ss:$0 sm:$0xff]  ;;  %v2699_v31 = vld [vmem:[%s3827_s3] ss:$0 sm:$0xff] }
   0x7   :  { %76 = vperm.xlu1 %3140, %v38_v2   ;;  %105 = vperm.xlu0 %3142, %v38_v2  }
   0x8   :  { %2875 = vmatpush3.msra.mxu0 %v241_v12 }
   0x9   :  { %2882 = vmatprep.subr.mxu0 %v3329_v15 }
   0xb   :  { %3141 = vset.pattern.permute.xlu1 %v3195_v4  ;;  %113 = vperm.xlu0 %3142, %v40_v5  }
   0xc   :  { %101 = vperm.xlu1 %3141, %v37_v3  }
   0xf   :  { %3146 = vset.pattern.permute.xlu0 %v3194_v1 }
  0x10   :  { %3143 = vset.pattern.permute.xlu1 %v3194_v1  ;;  %44 = vperm.xlu0 %3146, %v37_v3  }
  0x11   :  { %54 = vperm.xlu1 %3143, %v39_v7  }
  0x14   :  { %59 = vperm.xlu0 %3146, %v40_v5  }
  0x15   :  { %3144 = vset.pattern.permute.xlu1 %v3193_v0 }
  0x16   :  { %80 = vperm.xlu1 %3144, %v39_v7  }
  0x18   :  { %229 = vperm.xlu0 %3146, %v3287_v8  }
  0x1a   :  { %84 = vperm.xlu1 %3144, %v40_v5  }
  0x1c   :  { %3149 = vset.pattern.permute.xlu0 %v3193_v0 }
  0x1d   :  { %389 = vperm.xlu0 %3149, %v3293_v9  }
  0x1e   :  { %3145 = vset.pattern.permute.xlu1 %v3195_v4 }
  0x1f   :  { %109 = vperm.xlu1 %3145, %v39_v7  }
  0x21   :  { %3150 = vset.pattern.permute.xlu0 %v3195_v4 }
  0x22   :  { %540 = vperm.xlu0 %3150, %v3301_v10  }
  0x23   :  { %3147 = vset.pattern.permute.xlu1 %v3194_v1 }
  0x24   :  { %219 = vperm.xlu1 %3147, %v3301_v10  }
  0x26   :  { %552 = vperm.xlu0 %3150, %v3309_v11  }
  0x28   :  { %224 = vperm.xlu1 %3147, %v3293_v9  }
  0x2a   :  { %3153 = vset.pattern.permute.xlu0 %v3197_v13 }
  0x2b   :  { %699 = vperm.xlu0 %3153, %v3293_v9  }
  0x2c   :  { %234 = vperm.xlu1 %3147, %v3309_v11  }
  0x2f   :  { %3154 = vset.pattern.permute.xlu0 %v3198_v14 }
  0x30   :  { %3148 = vset.pattern.permute.xlu1 %v3193_v0  ;;  %850 = vperm.xlu0 %3154, %v3301_v10  }
  0x31   :  { %385 = vperm.xlu1 %3148, %v3301_v10  }
  0x34   :  { %862 = vperm.xlu0 %3154, %v3309_v11  }
  0x35   :  { %393 = vperm.xlu1 %3148, %v3287_v8  }
  0x38   :  { %3157 = vset.pattern.permute.xlu0 %v3199_v16 }
  0x39   :  { %397 = vperm.xlu1 %3148, %v3309_v11   ;;  %1009 = vperm.xlu0 %3157, %v3293_v9  }
  0x3d   :  { %3151 = vset.pattern.permute.xlu1 %v3195_v4  ;;  %3158 = vset.pattern.permute.xlu0 %v3200_v17 }
  0x3e   :  { %544 = vperm.xlu1 %3151, %v3293_v9   ;;  %1160 = vperm.xlu0 %3158, %v3301_v10  }
  0x42   :  { %548 = vperm.xlu1 %3151, %v3287_v8   ;;  %1172 = vperm.xlu0 %3158, %v3309_v11  }
  0x46   :  { %3152 = vset.pattern.permute.xlu1 %v3197_v13  ;;  %3161 = vset.pattern.permute.xlu0 %v3201_v18 }
  0x47   :  { %695 = vperm.xlu1 %3152, %v3301_v10   ;;  %1319 = vperm.xlu0 %3161, %v3293_v9  }
  0x4b   :  { %703 = vperm.xlu1 %3152, %v3287_v8   ;;  %3162 = vset.pattern.permute.xlu0 %v3202_v19 }
  0x4c   :  { %1470 = vperm.xlu0 %3162, %v3301_v10  }
  0x4f   :  { %707 = vperm.xlu1 %3152, %v3309_v11  }
  0x50   :  { %1482 = vperm.xlu0 %3162, %v3309_v11  }
  0x53   :  { %3155 = vset.pattern.permute.xlu1 %v3198_v14 }
  0x54   :  { %854 = vperm.xlu1 %3155, %v3293_v9   ;;  %3164 = vset.pattern.permute.xlu0 %v3194_v1 }
  0x58   :  { %858 = vperm.xlu1 %3155, %v3287_v8  }
  0x5c   :  { %3156 = vset.pattern.permute.xlu1 %v3199_v16 }
  0x5d   :  { %1005 = vperm.xlu1 %3156, %v3301_v10  }
  0x61   :  { %1013 = vperm.xlu1 %3156, %v3287_v8  }
  0x65   :  { %1017 = vperm.xlu1 %3156, %v3309_v11  }
  0x69   :  { %3159 = vset.pattern.permute.xlu1 %v3200_v17 }
  0x6a   :  { %1164 = vperm.xlu1 %3159, %v3293_v9  }
  0x6e   :  { %1168 = vperm.xlu1 %3159, %v3287_v8  }
  0x72   :  { %3160 = vset.pattern.permute.xlu1 %v3201_v18 }
  0x73   :  { %1315 = vperm.xlu1 %3160, %v3301_v10  }
  0x77   :  { %1323 = vperm.xlu1 %3160, %v3287_v8  }
  0x7b   :  { %1327 = vperm.xlu1 %3160, %v3309_v11  }
  0x7f   :  { %3163 = vset.pattern.permute.xlu1 %v3202_v19 }
  0x80   :  { %1474 = vperm.xlu1 %3163, %v3293_v9  }
  0x81   :  { %v50_v20 = vpop.permute.xlu1 %49  ;;  %v73_v21 = vpop.permute.xlu0 %72 }
  0x82   :  { %v67_v27 = vmul.f32 %v2696_v22, %v50_v20  ;;  %v91_v38 = vmul.f32 %v2697_v23, %v73_v21 }
  0x84   :  { %1478 = vperm.xlu1 %3163, %v3287_v8  }
  0x86   :  { %v77_v25 = vpop.permute.xlu1 %76  ;;  %v106_v26 = vpop.permute.xlu0 %105 }
  0x87   :  { %v92_v28 = vmul.f32 %v2697_v23, %v77_v25  ;;  %v121_v29 = vmul.f32 %v2698_v24, %v106_v26 }
  0x88   :  { %3168 = vset.pattern.permute.xlu1 %v3194_v1 }
  0x89   :  { %v96_v30 = vadd.f32 %v92_v28, %v67_v27  ;;  %v559_v27 = vld [vmem:[%s3825_s4 + $0x12] sm:$0xff] }
  0x8a   :  { %v114_v32 = vpop.permute.xlu0 %113 }
  0x8b   :  { %v125_v33 = vadd.f32 %v121_v29, %v96_v30  ;;  %v102_v34 = vpop.permute.xlu1 %101  ;;  %v123_v54 = vmul.f32 %v2698_v24, %v114_v32 }
  0x8c   :  { %v120_v42 = vmul.f32 %v2698_v24, %v102_v34 }
  0x8d   :  { %v136_v35 = vadd.f32 %v2699_v31, %v125_v33 }
  0x8f   :  { %v140_v36 = vmul.f32 0.2, %v136_v35  ;;  %v45_v37 = vpop.permute.xlu0 %44 }
  0x90   :  { %v66_v39 = vmul.f32 %v2696_v22, %v45_v37  ;;  %v55_v40 = vpop.permute.xlu1 %54 }
  0x91   :  { %v144_v41 = vmax.f32 %v136_v35, %v140_v36  ;;  %v68_v56 = vmul.f32 %v2696_v22, %v55_v40 }
  0x92   :  { %v95_v43 = vadd.f32 %v91_v38, %v66_v39 }
  0x93   :  { %202 = vst.msk [vmem:[#allocation2 + $0x10] sm:$0xff] %vm175_vm0, %v144_v41  ;;  %v60_v47 = vpop.permute.xlu0 %59 }
  0x94   :  { %v124_v44 = vadd.f32 %v120_v42, %v95_v43  ;;  %v69_v49 = vmul.f32 %v2696_v22, %v60_v47 }
  0x95   :  { %v81_v45 = vpop.permute.xlu1 %80 }
  0x96   :  { %v135_v46 = vadd.f32 %v2699_v31, %v124_v44  ;;  %v93_v53 = vmul.f32 %v2697_v23, %v81_v45 }
  0x97   :  { %v3402_v37 = vpop.permute.xlu0 %229 }
  0x98   :  { %v139_v48 = vmul.f32 0.2, %v135_v46  ;;  %v97_v59 = vadd.f32 %v93_v53, %v68_v56 }
  0x99   :  { %v85_v50 = vpop.permute.xlu1 %84 }
  0x9a   :  { %v143_v51 = vmax.f32 %v135_v46, %v139_v48  ;;  %v94_v52 = vmul.f32 %v2697_v23, %v85_v50 }
  0x9c   :  { %201 = vst.msk [vmem:[#allocation2 + $0x8] sm:$0xff] %vm175_vm0, %v143_v51  ;;  %v98_v55 = vadd.f32 %v94_v52, %v69_v49  ;;  %v3414_v45 = vpop.permute.xlu0 %389 }
  0x9e   :  { %v127_v57 = vadd.f32 %v123_v54, %v98_v55  ;;  %v110_v58 = vpop.permute.xlu1 %109  ;;  %v714_v55 = vld [vmem:[%s3825_s4 + $0x1b] sm:$0xff] }
  0x9f   :  { %v122_v60 = vmul.f32 %v2698_v24, %v110_v58 }
  0xa0   :  { %v138_v61 = vadd.f32 %v2699_v31, %v127_v57 }
  0xa1   :  { %v126_v62 = vadd.f32 %v122_v60, %v97_v59  ;;  %v3437_v57 = vpop.permute.xlu0 %540 }
  0xa2   :  { %v142_v63 = vmul.f32 0.2, %v138_v61 }
  0xa3   :  { %v137_v2 = vadd.f32 %v2699_v31, %v126_v62  ;;  %v3383_v3 = vpop.permute.xlu1 %219  ;;  %v213_v5 = vld [vmem:[#allocation2 + $0x3] sm:$0xff]  ;;  %v3390_v23 = vld [vmem:[#allocation2 + $0xb] sm:$0xff] }
  0xa4   :  { %v146_v6 = vmax.f32 %v138_v61, %v142_v63  ;;  %v237_v7 = vmul.f32 %v3383_v3, %v213_v5  ;;  %v380_v46 = vld [vmem:[#allocation2 + $0x4] sm:$0xff]  ;;  %v3416_v47 = vld [vmem:[#allocation2 + $0xc] sm:$0xff] }
  0xa5   :  { %v141_v12 = vmul.f32 0.2, %v137_v2  ;;  %v401_v50 = vmul.f32 %v3414_v45, %v3416_v47  ;;  %v535_v56 = vld [vmem:[#allocation2 + $0x5] sm:$0xff] }
  0xa6   :  { %v148_v20 = vadd.f32 %v146_v6, %v144_v41  ;;  %204 = vst.msk [vmem:[#allocation2 + $0x20] sm:$0xff] %vm175_vm0, %v146_v6  ;;  %2876 = vmatprep.mubr.msk.f32.mxu0 %vm175_vm0, %v237_v7  ;;  %v555_v61 = vmul.f32 %v3437_v57, %v535_v56 }
  0xa7   :  { %v145_v21 = vmax.f32 %v137_v2, %v141_v12  ;;  %v3388_v22 = vpop.permute.xlu1 %224  ;;  %v3447_v2 = vld [vmem:[#allocation2 + $0xd] sm:$0xff] }
  0xa8   :  { %v150_v24 = vmul.f32 0.5, %v148_v20  ;;  %v238_v25 = vmul.f32 %v3388_v22, %v3390_v23  ;;  %v3452_v20 = vpop.permute.xlu0 %552 }
  0xa9   :  { %v147_v26 = vadd.f32 %v145_v21, %v143_v51  ;;  %203 = vst.msk [vmem:[#allocation2 + $0x18] sm:$0xff] %vm175_vm0, %v145_v21 }
  0xaa   :  { %v152_v28 = vsub.f32 %v144_v41, %v150_v24  ;;  %v156_v29 = vsub.f32 %v146_v6, %v150_v24  ;;  %2877 = vmatmul.mubr.msk.f32.vlgmr.msra.gmra.mrb[0].mxu0 %vm175_vm0, %v238_v25 }
  0xab   :  { %v149_v30 = vmul.f32 0.5, %v147_v26  ;;  %v3399_v31 = vpop.permute.xlu1 %234  ;;  %2883 = vmatpush3.msra.mxu0 %v3329_v15 }
  0xac   :  { %v154_v32 = vmul.f32 %v152_v28, %v152_v28  ;;  %v158_v33 = vmul.f32 %v156_v29, %v156_v29  ;;  %2890 = vmatprep.subr.mxu0 %v559_v27 }
  0xad   :  { %v151_v34 = vsub.f32 %v143_v51, %v149_v30  ;;  %v155_v35 = vsub.f32 %v145_v21, %v149_v30 }
  0xae   :  { %v160_v36 = vadd.f32 %v158_v33, %v154_v32 }
  0xaf   :  { %v153_v38 = vmul.f32 %v151_v34, %v151_v34  ;;  %v157_v39 = vmul.f32 %v155_v35, %v155_v35 }
  0xb0   :  { %v3404_v40 = vld [vmem:[#allocation2 + $0x1b] sm:$0xff]  ;;  %v3406_v41 = vpop.permute.xlu1 %385  ;;  %v3408_v42 = vld [vmem:[#allocation2 + $0x13] sm:$0xff]  ;;  %3189 = vrsqrt.f32 %v160_v36  ;;  %vm170_vm1 = vcmp.eq.f32.partialorder %v160_v36, inf  ;;  %v173_v6 = vand.u32 2147483648, %v160_v36  ;;  %vm172_vm2 = vcmp.eq.f32.partialorder %v160_v36, 0.0 }
  0xb1   :  { %v159_v43 = vadd.f32 %v157_v39, %v153_v38  ;;  %v240_v15 = vmul.f32 %v3399_v31, %v3404_v40  ;;  %v239_v44 = vmul.f32 %v3402_v37, %v3408_v42  ;;  %v400_v48 = vmul.f32 %v3406_v41, %v380_v46  ;;  %v3426_v51 = vld [vmem:[#allocation2 + $0x14] sm:$0xff]  ;;  %v3432_v54 = vld [vmem:[#allocation2 + $0x1c] sm:$0xff]  ;;  %v3471_v38 = vpop.permute.xlu0 %699 }
  0xb2   :  { %v3454_v25 = vld [vmem:[#allocation2 + $0x1d] sm:$0xff]  ;;  %v3462_v29 = vld [vmem:[#allocation2 + $0x15] sm:$0xff] }
  0xb3   :  { %3191 = vrsqrt.f32 %v159_v43  ;;  %2879 = vmatprep.mubr.msk.f32.mxu0 %vm175_vm0, %v239_v44  ;;  %vm163_vm3 = vcmp.eq.f32.partialorder %v159_v43, inf  ;;  %v166_v21 = vand.u32 2147483648, %v159_v43  ;;  %vm165_vm4 = vcmp.eq.f32.partialorder %v159_v43, 0.0 }
  0xb4   :  { %v3420_v49 = vpop.permute.xlu1 %393  ;;  %2880 = vmatmul.mubr.msk.f32.gmra.mrb[2].mxu0 %vm175_vm0, %v240_v15  ;;  %v558_v35 = vmul.f32 %v3452_v20, %v3454_v25  ;;  %v691_v15 = vld [vmem:[#allocation2 + $0xf] sm:$0xff] }
  0xb5   :  { %2884 = vmatprep.mubr.msk.f32.mxu0 %vm175_vm0, %v400_v48  ;;  %v402_v52 = vmul.f32 %v3420_v49, %v3426_v51  ;;  %v711_v46 = vmul.f32 %v3471_v38, %v691_v15  ;;  %v1024_v48 = vld [vmem:[%s3825_s4 + $0x2d] sm:$0xff]  ;;  %v3486_v56 = vpop.permute.xlu0 %850 }
  0xb6   :  { %3857 = vst [vmem:[#allocation5_spill] sm:$0xff] %v3486_v56 }
  0xb8   :  { %v3430_v53 = vpop.permute.xlu1 %397  ;;  %2885 = vmatmul.mubr.msk.f32.vlgmr.msra.gmra.mrb[0].mxu0 %vm175_vm0, %v401_v50 }
  0xb9   :  { %v403_v58 = vmul.f32 %v3430_v53, %v3432_v54  ;;  %2887 = vmatprep.mubr.msk.f32.mxu0 %vm175_vm0, %v402_v52  ;;  %2891 = vmatpush3.msra.mxu0 %v559_v27  ;;  %v869_v27 = vld [vmem:[%s3825_s4 + $0x24] sm:$0xff]  ;;  %v692_v52 = vld [vmem:[#allocation2 + $0x17] sm:$0xff] }
  0xba   :  { %v3190_v59 = vpop.eup %3189  ;;  %2898 = vmatprep.subr.mxu0 %v714_v55 }
  0xbb   :  { %v169_v60 = vmul.f32 %v3190_v59, %v160_v36  ;;  %v693_v59 = vld [vmem:[#allocation2 + $0x1f] sm:$0xff] }
  0xbc   :  { %2888 = vmatmul.mubr.msk.f32.gmra.mrb[2].mxu0 %vm175_vm0, %v403_v58 }
  0xbd   :  { %v3192_v62 = vpop.eup %3191  ;;  %v3445_v63 = vpop.permute.xlu1 %544  ;;  %v171_v5 = vsel %vm170_vm1, %v160_v36, %v169_v60  ;;  %2892 = vmatprep.mubr.msk.f32.mxu0 %vm175_vm0, %v555_v61  ;;  %v845_v60 = vld [vmem:[#allocation2 + $0x8] sm:$0xff] }
  0xbe   :  { %v556_v7 = vmul.f32 %v3445_v63, %v3447_v2  ;;  %v162_v12 = vmul.f32 %v3192_v62, %v159_v43  ;;  %v174_v24 = vsel %vm172_vm2, %v173_v6, %v171_v5  ;;  %v865_v62 = vmul.f32 %v3486_v56, %v845_v60  ;;  %v846_v6 = vld [vmem:[#allocation2 + $0x10] sm:$0xff]  ;;  %v1003_v60 = vld [vmem:[#allocation2 + $0x21] sm:$0xff] }
  0xbf   :  { %v177_v34 = vsel %vm175_vm0, %v174_v24, 0.0  ;;  %v847_v24 = vld [vmem:[#allocation2 + $0x18] sm:$0xff] }
  0xc0   :  { %v164_v26 = vsel %vm163_vm3, %v159_v43, %v162_v12  ;;  %2893 = vmatmul.mubr.msk.f32.vlgmr.msra.gmra.mrb[0].mxu0 %vm175_vm0, %v556_v7  ;;  %v690_v43 = vld [vmem:[#allocation2 + $0x7] sm:$0xff]  ;;  %v3498_v12 = vpop.permute.xlu0 %862 }
  0xc1   :  { %v3460_v28 = vpop.permute.xlu1 %548  ;;  %v167_v30 = vsel %vm165_vm4, %v166_v21, %v164_v26  ;;  %2899 = vmatpush3.msra.mxu0 %v714_v55  ;;  %3860 = vst [vmem:[#allocation8_spill] sm:$0xff] %v3498_v12  ;;  %v1179_v21 = vld [vmem:[%s3825_s4 + $0x36] sm:$0xff] }
  0xc2   :  { %v557_v32 = vmul.f32 %v3460_v28, %v3462_v29  ;;  %v176_v33 = vsel %vm175_vm0, %v167_v30, 0.0  ;;  %2906 = vmatprep.subr.mxu0 %v869_v27 }
  0xc3   :  { %v178_v36 = vadd.f32 %v177_v34, %v176_v33 }
  0xc4   :  { %2895 = vmatprep.mubr.msk.f32.mxu0 %vm175_vm0, %v557_v32  ;;  %v3509_v33 = vpop.permute.xlu0 %1009 }
  0xc5   :  { %179 = vadd.xlane.f32.xlu1 %v178_v36  ;;  %2896 = vmatmul.mubr.msk.f32.gmra.mrb[2].mxu0 %vm175_vm0, %v558_v35  ;;  %3862 = vst [vmem:[#allocation10_spill] sm:$0xff] %v3509_v33  ;;  %v1000_v35 = vld [vmem:[#allocation2 + $0x9] sm:$0xff]  ;;  %v1001_v36 = vld [vmem:[#allocation2 + $0x11] sm:$0xff] }
  0xc6   :  { %v3474_v39 = vpop.permute.xlu1 %695  ;;  %v1021_v15 = vmul.f32 %v3509_v33, %v1001_v36 }
  0xc7   :  { %v710_v44 = vmul.f32 %v3474_v39, %v690_v43 }
  0xc9   :  { %2900 = vmatprep.mubr.msk.f32.mxu0 %vm175_vm0, %v710_v44  ;;  %v1334_v44 = vld [vmem:[%s3825_s4 + $0x3f] sm:$0xff] }
  0xca   :  { %v3482_v50 = vpop.permute.xlu1 %703  ;;  %2901 = vmatmul.mubr.msk.f32.vlgmr.msra.gmra.mrb[0].mxu0 %vm175_vm0, %v711_v46 }
  0xcb   :  { %3856 = vst [vmem:[#allocation4_spill] sm:$0xff] %v3482_v50  ;;  %v712_v55 = vmul.f32 %v3482_v50, %v692_v52  ;;  %2907 = vmatpush3.msra.mxu0 %v869_v27  ;;  %v848_v27 = vld [vmem:[#allocation2 + $0x20] sm:$0xff] }
  0xcc   :  { %2914 = vmatprep.subr.mxu0 %v1024_v48  ;;  %v868_v32 = vmul.f32 %v3498_v12, %v848_v27 }
  0xcd   :  { %2903 = vmatprep.mubr.msk.f32.mxu0 %vm175_vm0, %v712_v55  ;;  %v3524_v55 = vpop.permute.xlu0 %1160 }
  0xce   :  { %v3489_v58 = vpop.permute.xlu1 %707  ;;  %3865 = vst [vmem:[#allocation13_spill] sm:$0xff] %v3524_v55 }
  0xcf   :  { %3858 = vst [vmem:[#allocation6_spill] sm:$0xff] %v3489_v58  ;;  %v713_v61 = vmul.f32 %v3489_v58, %v693_v59 }
  0xd1   :  { %2904 = vmatmul.mubr.msk.f32.gmra.mrb[2].mxu0 %vm175_vm0, %v713_v61 }
  0xd2   :  { %2908 = vmatprep.mubr.msk.f32.mxu0 %vm175_vm0, %v865_v62  ;;  %v1175_v62 = vmul.f32 %v3524_v55, %v3390_v23  ;;  %v1158_v23 = vld [vmem:[#allocation2 + $0x23] sm:$0xff] }
  0xd3   :  { %v3495_v5 = vpop.permute.xlu1 %854 }
  0xd4   :  { %3859 = vst [vmem:[#allocation7_spill] sm:$0xff] %v3495_v5  ;;  %v866_v7 = vmul.f32 %v3495_v5, %v846_v6 }
  0xd6   :  { %2909 = vmatmul.mubr.msk.f32.vlgmr.msra.gmra.mrb[0].mxu0 %vm175_vm0, %v866_v7 }
  0xd7   :  { %v3504_v26 = vpop.permute.xlu1 %858  ;;  %2915 = vmatpush3.msra.mxu0 %v1024_v48  ;;  %v1002_v48 = vld [vmem:[#allocation2 + $0x19] sm:$0xff] }
  0xd8   :  { %3861 = vst [vmem:[#allocation9_spill] sm:$0xff] %v3504_v26  ;;  %v867_v30 = vmul.f32 %v3504_v26, %v847_v24  ;;  %2922 = vmatprep.subr.mxu0 %v1179_v21  ;;  %v1489_v24 = vld [vmem:[%s3825_s4 + $0x48] sm:$0xff] }
  0xda   :  { %2911 = vmatprep.mubr.msk.f32.mxu0 %vm175_vm0, %v867_v30 }
  0xdb   :  { %2912 = vmatmul.mubr.msk.f32.gmra.mrb[2].mxu0 %vm175_vm0, %v868_v32 }
  0xdc   :  { %v3512_v34 = vpop.permute.xlu1 %1005 }
  0xdd   :  { %3863 = vst [vmem:[#allocation11_spill] sm:$0xff] %v3512_v34  ;;  %v1020_v43 = vmul.f32 %v3512_v34, %v1000_v35 }
  0xdf   :  { %2916 = vmatprep.mubr.msk.f32.mxu0 %vm175_vm0, %v1020_v43 }
  0xe0   :  { %v3520_v46 = vpop.permute.xlu1 %1013  ;;  %2917 = vmatmul.mubr.msk.f32.vlgmr.msra.gmra.mrb[0].mxu0 %vm175_vm0, %v1021_v15 }
  0xe1   :  { %3864 = vst [vmem:[#allocation12_spill] sm:$0xff] %v3520_v46  ;;  %v1022_v52 = vmul.f32 %v3520_v46, %v1002_v48  ;;  %2923 = vmatpush3.msra.mxu0 %v1179_v21  ;;  %v3538_v21 = vpop.permute.xlu0 %1172 }
  0xe2   :  { %2930 = vmatprep.subr.mxu0 %v1334_v44  ;;  %3868 = vst [vmem:[#allocation16_spill] sm:$0xff] %v3538_v21  ;;  %v1178_v32 = vmul.f32 %v3538_v21, %v1158_v23 }
  0xe3   :  { %2919 = vmatprep.mubr.msk.f32.mxu0 %vm175_vm0, %v1022_v52 }
  0xe4   :  { %v3527_v59 = vpop.permute.xlu1 %1017 }
  0xe5   :  { %3866 = vst [vmem:[#allocation14_spill] sm:$0xff] %v3527_v59  ;;  %v1023_v61 = vmul.f32 %v3527_v59, %v1003_v60 }
  0xe7   :  { %2920 = vmatmul.mubr.msk.f32.gmra.mrb[2].mxu0 %vm175_vm0, %v1023_v61 }
  0xe8   :  { %2924 = vmatprep.mubr.msk.f32.mxu0 %vm175_vm0, %v1175_v62 }
  0xe9   :  { %v3534_v6 = vpop.permute.xlu1 %1164 }
  0xea   :  { %3867 = vst [vmem:[#allocation15_spill] sm:$0xff] %v3534_v6  ;;  %v1176_v7 = vmul.f32 %v3534_v6, %v3408_v42  ;;  %v3550_v42 = vpop.permute.xlu0 %1319 }
  0xeb   :  { %3870 = vst [vmem:[#allocation18_spill] sm:$0xff] %v3550_v42  ;;  %v1331_v43 = vmul.f32 %v3550_v42, %v3426_v51 }
  0xec   :  { %2925 = vmatmul.mubr.msk.f32.vlgmr.msra.gmra.mrb[0].mxu0 %vm175_vm0, %v1176_v7  ;;  %v1468_v7 = vld [vmem:[#allocation2 + $0x25] sm:$0xff] }
  0xed   :  { %v3544_v27 = vpop.permute.xlu1 %1168  ;;  %2931 = vmatpush3.msra.mxu0 %v1334_v44 }
  0xee   :  { %3869 = vst [vmem:[#allocation17_spill] sm:$0xff] %v3544_v27  ;;  %v1177_v30 = vmul.f32 %v3544_v27, %v3404_v40  ;;  %2938 = vmatprep.subr.mxu0 %v1489_v24  ;;  %v3565_v44 = vpop.permute.xlu0 %1470 }
  0xef   :  { %3873 = vst [vmem:[#allocation21_spill] sm:$0xff] %v3565_v44  ;;  %v1485_v51 = vmul.f32 %v3565_v44, %v3447_v2 }
  0xf0   :  { %2927 = vmatprep.mubr.msk.f32.mxu0 %vm175_vm0, %v1177_v30 }
  0xf1   :  { %2928 = vmatmul.mubr.msk.f32.gmra.mrb[2].mxu0 %vm175_vm0, %v1178_v32 }
  0xf2   :  { %v3553_v35 = vpop.permute.xlu1 %1315  ;;  %v3579_v61 = vpop.permute.xlu0 %1482 }
  0xf3   :  { %3871 = vst [vmem:[#allocation19_spill] sm:$0xff] %v3553_v35  ;;  %v1330_v36 = vmul.f32 %v3553_v35, %v3416_v47  ;;  %v1313_v47 = vld [vmem:[#allocation2 + $0x24] sm:$0xff]  ;;  %3876 = vst [vmem:[#allocation24_spill] sm:$0xff] %v3579_v61  ;;  %v1488_v2 = vmul.f32 %v3579_v61, %v1468_v7  ;;  %v2700_v61 = vld [vmem:[%s3829_s5] ss:$0 sm:$0xff] }
  0xf5   :  { %2932 = vmatprep.mubr.msk.f32.mxu0 %vm175_vm0, %v1330_v36 }
  0xf6   :  { %v3560_v40 = vpop.permute.xlu1 %1323  ;;  %2933 = vmatmul.mubr.msk.f32.vlgmr.msra.gmra.mrb[0].mxu0 %vm175_vm0, %v1331_v43 }
  0xf7   :  { %3872 = vst [vmem:[#allocation20_spill] sm:$0xff] %v3560_v40  ;;  %v1332_v15 = vmul.f32 %v3560_v40, %v3432_v54  ;;  %2939 = vmatpush3.msra.mxu0 %v1489_v24 }
  0xf9   :  { %2935 = vmatprep.mubr.msk.f32.mxu0 %vm175_vm0, %v1332_v15 }
  0xfa   :  { %v3568_v48 = vpop.permute.xlu1 %1327 }
  0xfb   :  { %3874 = vst [vmem:[#allocation22_spill] sm:$0xff] %v3568_v48  ;;  %v1333_v52 = vmul.f32 %v3568_v48, %v1313_v47 }
  0xfd   :  { %2936 = vmatmul.mubr.msk.f32.gmra.mrb[2].mxu0 %vm175_vm0, %v1333_v52 }
  0xfe   :  { %2940 = vmatprep.mubr.msk.f32.mxu0 %vm175_vm0, %v1485_v51 }
  0xff   :  { %v3575_v60 = vpop.permute.xlu1 %1474 }
 0x100   :  { %3875 = vst [vmem:[#allocation23_spill] sm:$0xff] %v3575_v60  ;;  %v1486_v54 = vmul.f32 %v3575_v60, %v3462_v29  ;;  %v2715_v60 = vld [vmem:[%s3825_s4 + $0x1a] ss:$0 sm:$0xff] }
 0x102   :  { %2941 = vmatmul.mubr.msk.f32.vlgmr.msra.gmra.mrb[0].mxu0 %vm175_vm0, %v1486_v54 }
 0x103   :  { %v3582_v62 = vpop.permute.xlu1 %1478 }
 0x104   :  { %3877 = vst [vmem:[#allocation25_spill] sm:$0xff] %v3582_v62  ;;  %v1487_v24 = vmul.f32 %v3582_v62, %v3454_v25 }
 0x106   :  { %2943 = vmatprep.mubr.msk.f32.mxu0 %vm175_vm0, %v1487_v24 }
 0x107   :  { %2944 = vmatmul.mubr.msk.f32.gmra.mrb[2].mxu0 %vm175_vm0, %v1488_v2 }
 0x152   :  { %v180_v23 = vpop.xlane.xlu1 %179 }
 0x153   :  { %v181_v30 = vrot.slane %v180_v23, 4 }
 0x155   :  { %v182_v32 = vadd.f32 %v181_v30, %v180_v23 }
 0x157   :  { %v183_v29 = vrot.slane %v182_v32, 2 }
 0x159   :  { %v184_v36 = vadd.f32 %v183_v29, %v182_v32 }
 0x15b   :  { %v185_v43 = vrot.slane %v184_v36, 1 }
 0x15d   :  { %v186_v15 = vadd.f32 %v185_v43, %v184_v36 }
 0x15f   :  { %3122 = vpush %v186_v15 }
 0x190   :  { %s3123_s1 = spop %3122 }
 0x191   :  { %v188_v47 = vstv %s3123_s1 }
 0x192   :  { %v190_v52 = vmul.f32 0.0078125, %v188_v47 }
 0x194   :  { %v343_v51 = vmul.f32 %v3301_v10, %v190_v52  ;;  %v346_v25 = vmul.f32 %v3309_v11, %v190_v52  ;;  %v344_v54 = vmul.f32 %v3293_v9, %v190_v52  ;;  %v345_v10 = vmul.f32 %v3287_v8, %v190_v52  ;;  %v1648_v11 = vld [vmem:[%s3828_s6] sm:$0xff] }
 0x195   :  { %2946 = vmatprep.subr.mxu1 %v1648_v11 }
 0x196   :  { %365 = vperm.xlu1 %3168, %v346_v25   ;;  %350 = vperm.xlu0 %3164, %v343_v51  }
 0x197   :  { %2947 = vmatpush3.msra.mxu1 %v1648_v11 }
 0x19a   :  { %3170 = vset.pattern.permute.xlu1 %v3197_v13  ;;  %355 = vperm.xlu0 %3164, %v344_v54  }
 0x19b   :  { %818 = vperm.xlu1 %3170, %v343_v51  }
 0x19e   :  { %3165 = vset.pattern.permute.xlu0 %v3193_v0 }
 0x19f   :  { %822 = vperm.xlu1 %3170, %v344_v54   ;;  %508 = vperm.xlu0 %3165, %v343_v51  }
 0x1a3   :  { %3172 = vset.pattern.permute.xlu1 %v3198_v14  ;;  %512 = vperm.xlu0 %3165, %v344_v54  }
 0x1a4   :  { %973 = vperm.xlu1 %3172, %v343_v51  }
 0x1a7   :  { %3166 = vset.pattern.permute.xlu0 %v3194_v1 }
 0x1a8   :  { %3173 = vset.pattern.permute.xlu1 %v3195_v4  ;;  %360 = vperm.xlu0 %3166, %v345_v10  }
 0x1a9   :  { %675 = vperm.xlu1 %3173, %v346_v25  }
 0x1ac   :  { %3167 = vset.pattern.permute.xlu0 %v3195_v4 }
 0x1ad   :  { %3175 = vset.pattern.permute.xlu1 %v3197_v13  ;;  %663 = vperm.xlu0 %3167, %v343_v51  }
 0x1ae   :  { %826 = vperm.xlu1 %3175, %v345_v10  }
 0x1b1   :  { %667 = vperm.xlu0 %3167, %v344_v54  }
 0x1b2   :  { %3176 = vset.pattern.permute.xlu1 %v3199_v16 }
 0x1b3   :  { %1128 = vperm.xlu1 %3176, %v343_v51  }
 0x1b5   :  { %3169 = vset.pattern.permute.xlu0 %v3193_v0 }
 0x1b6   :  { %516 = vperm.xlu0 %3169, %v345_v10  }
 0x1b7   :  { %1132 = vperm.xlu1 %3176, %v344_v54  }
 0x1ba   :  { %520 = vperm.xlu0 %3169, %v346_v25  }
 0x1bb   :  { %3178 = vset.pattern.permute.xlu1 %v3198_v14 }
 0x1bc   :  { %981 = vperm.xlu1 %3178, %v345_v10  }
 0x1be   :  { %3171 = vset.pattern.permute.xlu0 %v3195_v4 }
 0x1bf   :  { %671 = vperm.xlu0 %3171, %v345_v10  }
 0x1c0   :  { %985 = vperm.xlu1 %3178, %v346_v25  }
 0x1c3   :  { %3174 = vset.pattern.permute.xlu0 %v3198_v14 }
 0x1c4   :  { %3180 = vset.pattern.permute.xlu1 %v3200_v17  ;;  %977 = vperm.xlu0 %3174, %v344_v54  }
 0x1c5   :  { %1287 = vperm.xlu1 %3180, %v344_v54  }
 0x1c8   :  { %3177 = vset.pattern.permute.xlu0 %v3197_v13  ;;  %v3630_v13 = vld [vmem:[%s3828_s6 + $0x8] sm:$0xff] }
 0x1c9   :  { %3182 = vset.pattern.permute.xlu1 %v3201_v18  ;;  %830 = vperm.xlu0 %3177, %v346_v25  }
 0x1ca   :  { %1438 = vperm.xlu1 %3182, %v343_v51   ;;  %2954 = vmatprep.subr.mxu1 %v3630_v13 }
 0x1cd   :  { %3179 = vset.pattern.permute.xlu0 %v3200_v17 }
 0x1ce   :  { %3183 = vset.pattern.permute.xlu1 %v3199_v16  ;;  %1283 = vperm.xlu0 %3179, %v343_v51  }
 0x1cf   :  { %1140 = vperm.xlu1 %3183, %v346_v25  }
 0x1d2   :  { %3181 = vset.pattern.permute.xlu0 %v3199_v16 }
 0x1d3   :  { %3185 = vset.pattern.permute.xlu1 %v3200_v17  ;;  %1136 = vperm.xlu0 %3181, %v345_v10  }
 0x1d4   :  { %1291 = vperm.xlu1 %3185, %v345_v10  }
 0x1d5   :  { %v3612_v0 = vpop.f32.mrb[0].mxu0 }
 0x1d6   :  { %v3614_v4 = vpop.f32.mrb[1].mxu0 }
 0x1d7   :  { %3184 = vset.pattern.permute.xlu0 %v3201_v18 }
 0x1d8   :  { %1295 = vperm.xlu1 %3185, %v346_v25   ;;  %1442 = vperm.xlu0 %3184, %v344_v54  }
 0x1da   :  { %v3617_v8 = vpop.f32.mrb[2].mxu0 }
 0x1db   :  { %v3619_v9 = vpop.f32.mrb[3].mxu0 }
 0x1dc   :  { %3186 = vset.pattern.permute.xlu1 %v3202_v19  ;;  %1446 = vperm.xlu0 %3184, %v345_v10  }
 0x1dd   :  { %1593 = vperm.xlu1 %3186, %v343_v51   ;;  %v2705_v51 = vld [vmem:[%s3825_s4 + $0x8] ss:$0 sm:$0xff] }
 0x1e0   :  { %1450 = vperm.xlu0 %3184, %v346_v25  }
 0x1e1   :  { %1597 = vperm.xlu1 %3186, %v344_v54  }
 0x1e4   :  { %3187 = vset.pattern.permute.xlu0 %v3202_v19 }
 0x1e5   :  { %1605 = vperm.xlu1 %3186, %v346_v25   ;;  %1601 = vperm.xlu0 %3187, %v345_v10   ;;  %v2710_v25 = vld [vmem:[%s3825_s4 + $0x11] ss:$0 sm:$0xff] }
 0x1e9   :  { %3188 = vset.pattern.permute.xlu0 %v3194_v1 }
 0x215   :  { %v366_v14 = vpop.permute.xlu1 %365  ;;  %v351_v16 = vpop.permute.xlu0 %350 }
 0x216   :  { %v372_v10 = vmul.f32 %v2705_v51, %v351_v16  ;;  %v2720_v16 = vld [vmem:[%s3825_s4 + $0x23] ss:$0 sm:$0xff] }
 0x218   :  { %v3027_v44 = vadd.f32 %v2700_v61, %v372_v10 }
 0x219   :  { %v356_v17 = vpop.permute.xlu0 %355 }
 0x21a   :  { %v819_v18 = vpop.permute.xlu1 %818  ;;  %v373_v35 = vmul.f32 %v2705_v51, %v356_v17 }
 0x21b   :  { %v837_v46 = vmul.f32 %v2720_v16, %v819_v18 }
 0x21c   :  { %v3018_v59 = vadd.f32 %v2700_v61, %v373_v35 }
 0x21e   :  { %v823_v19 = vpop.permute.xlu1 %822  ;;  %v509_v7 = vpop.permute.xlu0 %508 }
 0x21f   :  { %v527_v62 = vmul.f32 %v2710_v25, %v509_v7 }
 0x221   :  { %v3028_v21 = vadd.f32 %v3027_v44, %v527_v62  ;;  %v375_v44 = vmul.f32 %v2705_v51, %v366_v14  ;;  %v2730_v62 = vld [vmem:[%s3825_s4 + $0x35] ss:$0 sm:$0xff] }
 0x222   :  { %v513_v1 = vpop.permute.xlu0 %512 }
 0x223   :  { %v974_v24 = vpop.permute.xlu1 %973  ;;  %v528_v27 = vmul.f32 %v2710_v25, %v513_v1 }
 0x225   :  { %v3019_v10 = vadd.f32 %v3018_v59, %v528_v27  ;;  %v3036_v59 = vadd.f32 %v2700_v61, %v375_v44 }
 0x227   :  { %v361_v2 = vpop.permute.xlu0 %360 }
 0x228   :  { %v676_v23 = vpop.permute.xlu1 %675  ;;  %v374_v7 = vmul.f32 %v2705_v51, %v361_v2  ;;  %v838_v2 = vmul.f32 %v2720_v16, %v823_v19 }
 0x22c   :  { %v664_v30 = vpop.permute.xlu0 %663 }
 0x22d   :  { %v827_v32 = vpop.permute.xlu1 %826  ;;  %v682_v48 = vmul.f32 %v2715_v60, %v664_v30  ;;  %v2725_v30 = vld [vmem:[%s3825_s4 + $0x2c] ss:$0 sm:$0xff] }
 0x22e   :  { %v992_v1 = vmul.f32 %v2725_v30, %v974_v24 }
 0x22f   :  { %v3029_v6 = vadd.f32 %v3028_v21, %v682_v48  ;;  %v3045_v21 = vadd.f32 %v2700_v61, %v374_v7 }
 0x230   :  { %v668_v29 = vpop.permute.xlu0 %667 }
 0x231   :  { %v683_v33 = vmul.f32 %v2715_v60, %v668_v29  ;;  %v3030_v12 = vadd.f32 %v3029_v6, %v837_v46  ;;  %v2735_v46 = vld [vmem:[%s3825_s4 + $0x3e] ss:$0 sm:$0xff] }
 0x232   :  { %v1129_v36 = vpop.permute.xlu1 %1128 }
 0x233   :  { %v3020_v48 = vadd.f32 %v3019_v10, %v683_v33  ;;  %v1147_v5 = vmul.f32 %v2730_v62, %v1129_v36  ;;  %v3031_v56 = vadd.f32 %v3030_v12, %v992_v1  ;;  %v839_v33 = vmul.f32 %v2720_v16, %v827_v32  ;;  %v2740_v12 = vld [vmem:[%s3825_s4 + $0x47] ss:$0 sm:$0xff] }
 0x235   :  { %v517_v43 = vpop.permute.xlu0 %516  ;;  %v3021_v27 = vadd.f32 %v3020_v48, %v838_v2  ;;  %v3032_v51 = vadd.f32 %v3031_v56, %v1147_v5 }
 0x236   :  { %v1133_v15 = vpop.permute.xlu1 %1132  ;;  %v529_v17 = vmul.f32 %v2710_v25, %v517_v43 }
 0x238   :  { %v3046_v58 = vadd.f32 %v3045_v21, %v529_v17 }
 0x239   :  { %v521_v47 = vpop.permute.xlu0 %520 }
 0x23a   :  { %v530_v29 = vmul.f32 %v2710_v25, %v521_v47  ;;  %v685_v47 = vmul.f32 %v2715_v60, %v676_v23 }
 0x23b   :  { %v982_v52 = vpop.permute.xlu1 %981 }
 0x23c   :  { %v3037_v24 = vadd.f32 %v3036_v59, %v530_v29  ;;  %v994_v10 = vmul.f32 %v2725_v30, %v982_v52 }
 0x23e   :  { %v672_v54 = vpop.permute.xlu0 %671  ;;  %v3038_v7 = vadd.f32 %v3037_v24, %v685_v47 }
 0x23f   :  { %v3639_v11 = vpop.permute.xlu1 %985  ;;  %v684_v35 = vmul.f32 %v2715_v60, %v672_v54 }
 0x241   :  { %v3047_v6 = vadd.f32 %v3046_v58, %v684_v35 }
 0x243   :  { %v978_v40 = vpop.permute.xlu0 %977  ;;  %v3048_v61 = vadd.f32 %v3047_v6, %v839_v33 }
 0x244   :  { %v1288_v42 = vpop.permute.xlu1 %1287  ;;  %v993_v50 = vmul.f32 %v2725_v30, %v978_v40  ;;  %v1148_v40 = vmul.f32 %v2730_v62, %v1133_v15  ;;  %v2745_v15 = vld [vmem:[%s3825_s4 + $0x50] ss:$0 sm:$0xff] }
 0x245   :  { %v1303_v56 = vmul.f32 %v2735_v46, %v1288_v42  ;;  %v3049_v5 = vadd.f32 %v3048_v61, %v994_v10 }
 0x246   :  { %v3022_v54 = vadd.f32 %v3021_v27, %v993_v50 }
 0x248   :  { %v831_v55 = vpop.permute.xlu0 %830  ;;  %v3023_v58 = vadd.f32 %v3022_v54, %v1148_v40 }
 0x249   :  { %v1439_v34 = vpop.permute.xlu1 %1438  ;;  %v840_v25 = vmul.f32 %v2720_v16, %v831_v55  ;;  %v995_v55 = vmul.f32 %v2725_v30, %v3639_v11 }
 0x24a   :  { %v1457_v17 = vmul.f32 %v2740_v12, %v1439_v34  ;;  %v3024_v16 = vadd.f32 %v3023_v58, %v1303_v56 }
 0x24b   :  { %v3039_v32 = vadd.f32 %v3038_v7, %v840_v25 }
 0x24d   :  { %v1284_v18 = vpop.permute.xlu0 %1283  ;;  %v3040_v34 = vadd.f32 %v3039_v32, %v995_v55 }
 0x24e   :  { %v1141_v26 = vpop.permute.xlu1 %1140  ;;  %v1302_v14 = vmul.f32 %v2735_v46, %v1284_v18 }
 0x24f   :  { %v1150_v23 = vmul.f32 %v2730_v62, %v1141_v26 }
 0x250   :  { %v3033_v36 = vadd.f32 %v3032_v51, %v1302_v14 }
 0x251   :  { %v3041_v27 = vadd.f32 %v3040_v34, %v1150_v23 }
 0x252   :  { %v1137_v43 = vpop.permute.xlu0 %1136  ;;  %v3034_v50 = vadd.f32 %v3033_v36, %v1457_v17 }
 0x253   :  { %v1292_v19 = vpop.permute.xlu1 %1291  ;;  %v1149_v44 = vmul.f32 %v2730_v62, %v1137_v43 }
 0x254   :  { %v1304_v52 = vmul.f32 %v2735_v46, %v1292_v19  ;;  %v3035_v42 = vadd.f32 %v3034_v50, %v3614_v4  ;;  %v1868_v50 = vld [vmem:[%s3828_s6 + $0x10] sm:$0xff] }
 0x255   :  { %v3050_v48 = vadd.f32 %v3049_v5, %v1149_v44 }
 0x257   :  { %v1296_v1 = vpop.permute.xlu1 %1295  ;;  %v1443_v21 = vpop.permute.xlu0 %1442  ;;  %v3051_v14 = vadd.f32 %v3050_v48, %v1304_v52 }
 0x258   :  { %v1458_v60 = vmul.f32 %v2740_v12, %v1443_v21  ;;  %v1305_v18 = vmul.f32 %v2735_v46, %v1296_v1 }
 0x25a   :  { %v3025_v29 = vadd.f32 %v3024_v16, %v1458_v60  ;;  %v3042_v30 = vadd.f32 %v3041_v27, %v1305_v18 }
 0x25b   :  { %v1447_v35 = vpop.permute.xlu0 %1446 }
 0x25c   :  { %v1594_v2 = vpop.permute.xlu1 %1593  ;;  %v1459_v59 = vmul.f32 %v2740_v12, %v1447_v35  ;;  %v3026_v51 = vadd.f32 %v3025_v29, %v3612_v0 }
 0x25d   :  { %v1612_v6 = vmul.f32 %v2745_v15, %v1594_v2 }
 0x25e   :  { %v3052_v43 = vadd.f32 %v3051_v14, %v1459_v59 }
 0x25f   :  { %v1616_v11 = vadd.f32 %v3035_v42, %v1612_v6  ;;  %v1451_v26 = vpop.permute.xlu0 %1450  ;;  %v3878_v6 = vld [vmem:[#allocation4_spill] sm:$0xff] }
 0x260   :  { %v1460_v62 = vmul.f32 %v2740_v12, %v1451_v26  ;;  %v1598_v24 = vpop.permute.xlu1 %1597  ;;  %v3053_v7 = vadd.f32 %v3052_v43, %v3619_v9  ;;  %v3881_v43 = vld [vmem:[#allocation7_spill] sm:$0xff] }
 0x261   :  { %v1620_v33 = vmul.f32 0.2, %v1616_v11  ;;  %v1613_v54 = vmul.f32 %v2745_v15, %v1598_v24 }
 0x262   :  { %v3043_v19 = vadd.f32 %v3042_v30, %v1460_v62  ;;  %v3880_v30 = vld [vmem:[#allocation5_spill] sm:$0xff] }
 0x263   :  { %v1624_v46 = vmax.f32 %v1616_v11, %v1620_v33  ;;  %v1617_v47 = vadd.f32 %v3026_v51, %v1613_v54  ;;  %v2198_v11 = vld [vmem:[%s3828_s6 + $0x28] sm:$0xff]  ;;  %v3882_v51 = vld [vmem:[#allocation9_spill] sm:$0xff] }
 0x264   :  { %v1606_v25 = vpop.permute.xlu1 %1605  ;;  %v3044_v40 = vadd.f32 %v3043_v19, %v3617_v8  ;;  %v1602_v4 = vpop.permute.xlu0 %1601 }
 0x265   :  { %1628 = vst.msk [vmem:[#allocation2 + $0x8] sm:$0xff] %vm175_vm0, %v1624_v46  ;;  %v1621_v61 = vmul.f32 0.2, %v1617_v47  ;;  %v1615_v36 = vmul.f32 %v2745_v15, %v1606_v25  ;;  %v1614_v12 = vmul.f32 %v2745_v15, %v1602_v4  ;;  %v2308_v46 = vld [vmem:[%s3828_s6 + $0x30] sm:$0xff] }
 0x266   :  { %v3883_v25 = vld [vmem:[#allocation8_spill] sm:$0xff]  ;;  %v3884_v4 = vld [vmem:[#allocation11_spill] sm:$0xff] }
 0x267   :  { %v1625_v10 = vmax.f32 %v1617_v47, %v1621_v61  ;;  %v1619_v58 = vadd.f32 %v3044_v40, %v1615_v36  ;;  %v1618_v17 = vadd.f32 %v3053_v7, %v1614_v12  ;;  %v3885_v12 = vld [vmem:[#allocation10_spill] sm:$0xff] }
 0x269   :  { %1629 = vst.msk [vmem:[#allocation2 + $0x10] sm:$0xff] %vm175_vm0, %v1625_v10  ;;  %v1623_v0 = vmul.f32 0.2, %v1619_v58  ;;  %v1622_v44 = vmul.f32 0.2, %v1618_v17 }
 0x26b   :  { %v1627_v1 = vmax.f32 %v1619_v58, %v1623_v0  ;;  %v1626_v21 = vmax.f32 %v1618_v17, %v1622_v44  ;;  %v3886_v58 = vld [vmem:[#allocation12_spill] sm:$0xff] }
 0x26c   :  { %v1640_v32 = vld [vmem:[#allocation2 + $0x3] sm:$0xff]  ;;  %v2418_v44 = vld [vmem:[%s3828_s6 + $0x38] sm:$0xff] }
 0x26d   :  { %1631 = vst.msk [vmem:[#allocation2 + $0x20] sm:$0xff] %vm175_vm0, %v1627_v1  ;;  %1630 = vst.msk [vmem:[#allocation2 + $0x18] sm:$0xff] %vm175_vm0, %v1626_v21  ;;  %v1644_v8 = vmul.f32 %v1640_v32, %v3383_v3  ;;  %v1750_v3 = vld [vmem:[#allocation2 + $0x4] sm:$0xff]  ;;  %v3888_v32 = vld [vmem:[#allocation13_spill] sm:$0xff] }
 0x26e   :  { %v1860_v48 = vld [vmem:[#allocation2 + $0x5] sm:$0xff] }
 0x26f   :  { %2948 = vmatprep.mubr.msk.f32.mxu1 %vm175_vm0, %v1644_v8  ;;  %v3887_v1 = vld [vmem:[#allocation14_spill] sm:$0xff] }
 0x270   :  { %v3676_v9 = vld [vmem:[#allocation2 + $0xb] sm:$0xff] }
 0x271   :  { %v1645_v56 = vmul.f32 %v3676_v9, %v3388_v22  ;;  %v1754_v22 = vmul.f32 %v1750_v3, %v3406_v41  ;;  %v3695_v15 = vld [vmem:[#allocation2 + $0xc] sm:$0xff]  ;;  %v1978_v41 = vld [vmem:[%s3828_s6 + $0x18] sm:$0xff]  ;;  %v2304_v8 = vmul.f32 %v3676_v9, %v3888_v32 }
 0x272   :  { %v1755_v16 = vmul.f32 %v3695_v15, %v3414_v45  ;;  %v1864_v45 = vmul.f32 %v1860_v48, %v3437_v57  ;;  %v3715_v35 = vld [vmem:[#allocation2 + $0xd] sm:$0xff]  ;;  %v3890_v3 = vld [vmem:[#allocation17_spill] sm:$0xff] }
 0x273   :  { %2949 = vmatmul.mubr.msk.f32.vlgmr.msra.gmra.mrb[0].mxu1 %vm175_vm0, %v1645_v56  ;;  %v1865_v34 = vmul.f32 %v3715_v35, %v3445_v63  ;;  %v1970_v57 = vld [vmem:[#allocation2 + $0x7] sm:$0xff]  ;;  %v1971_v59 = vld [vmem:[#allocation2 + $0xf] sm:$0xff] }
 0x274   :  { %2955 = vmatpush3.msra.mxu1 %v3630_v13  ;;  %v3685_v5 = vld [vmem:[#allocation2 + $0x13] sm:$0xff]  ;;  %v3687_v60 = vld [vmem:[#allocation2 + $0x1b] sm:$0xff]  ;;  %v1974_v63 = vmul.f32 %v1970_v57, %v3474_v39  ;;  %v1975_v42 = vmul.f32 %v1971_v59, %v3471_v38  ;;  %v2190_v47 = vld [vmem:[#allocation2 + $0x9] sm:$0xff] }
 0x275   :  { %v1646_v55 = vmul.f32 %v3685_v5, %v3402_v37  ;;  %v1647_v23 = vmul.f32 %v3687_v60, %v3399_v31  ;;  %2962 = vmatprep.subr.mxu1 %v1868_v50  ;;  %v3698_v13 = vld [vmem:[#allocation2 + $0x14] sm:$0xff]  ;;  %v3705_v31 = vld [vmem:[#allocation2 + $0x1c] sm:$0xff]  ;;  %v2194_v61 = vmul.f32 %v2190_v47, %v3884_v4  ;;  %v3889_v56 = vld [vmem:[#allocation15_spill] sm:$0xff] }
 0x276   :  { %v1756_v37 = vmul.f32 %v3698_v13, %v3420_v49  ;;  %v1757_v52 = vmul.f32 %v3705_v31, %v3430_v53  ;;  %v3718_v49 = vld [vmem:[#allocation2 + $0x15] sm:$0xff]  ;;  %v3725_v2 = vld [vmem:[#allocation2 + $0x1d] sm:$0xff]  ;;  %v3897_v57 = vld [vmem:[#allocation23_spill] sm:$0xff] }
 0x277   :  { %2951 = vmatprep.mubr.msk.f32.mxu1 %vm175_vm0, %v1646_v55  ;;  %v1866_v18 = vmul.f32 %v3718_v49, %v3460_v28  ;;  %v2088_v53 = vld [vmem:[%s3828_s6 + $0x20] sm:$0xff]  ;;  %v1867_v29 = vmul.f32 %v3725_v2, %v3452_v20  ;;  %v1972_v28 = vld [vmem:[#allocation2 + $0x17] sm:$0xff]  ;;  %v2080_v20 = vld [vmem:[#allocation2 + $0x8] sm:$0xff]  ;;  %v2306_v55 = vmul.f32 %v3687_v60, %v3890_v3 }
 0x278   :  { %2952 = vmatmul.mubr.msk.f32.gmra.mrb[2].mxu1 %vm175_vm0, %v1647_v23  ;;  %v1976_v27 = vmul.f32 %v1972_v28, %v3878_v6  ;;  %v1973_v14 = vld [vmem:[#allocation2 + $0x1f] sm:$0xff]  ;;  %v2084_v62 = vmul.f32 %v2080_v20, %v3880_v30  ;;  %v2081_v24 = vld [vmem:[#allocation2 + $0x10] sm:$0xff] }
 0x279   :  { %2956 = vmatprep.mubr.msk.f32.mxu1 %vm175_vm0, %v1754_v22  ;;  %v3879_v39 = vld [vmem:[#allocation6_spill] sm:$0xff]  ;;  %v2082_v38 = vld [vmem:[#allocation2 + $0x18] sm:$0xff]  ;;  %v2085_v33 = vmul.f32 %v2081_v24, %v3881_v43 }
 0x27a   :  { %v1977_v26 = vmul.f32 %v1973_v14, %v3879_v39  ;;  %v2086_v54 = vmul.f32 %v2082_v38, %v3882_v51  ;;  %v2083_v19 = vld [vmem:[#allocation2 + $0x20] sm:$0xff]  ;;  %v2191_v36 = vld [vmem:[#allocation2 + $0x11] sm:$0xff] }
 0x27b   :  { %v2087_v40 = vmul.f32 %v2083_v19, %v3883_v25  ;;  %v2192_v7 = vld [vmem:[#allocation2 + $0x19] sm:$0xff]  ;;  %v2195_v10 = vmul.f32 %v2191_v36, %v3885_v12  ;;  %v2193_v0 = vld [vmem:[#allocation2 + $0x21] sm:$0xff]  ;;  %v3891_v9 = vld [vmem:[#allocation16_spill] sm:$0xff] }
 0x27c   :  { %2957 = vmatmul.mubr.msk.f32.vlgmr.msra.gmra.mrb[0].mxu1 %vm175_vm0, %v1755_v16  ;;  %v2196_v17 = vmul.f32 %v2192_v7, %v3886_v58  ;;  %v2197_v21 = vmul.f32 %v2193_v0, %v3887_v1  ;;  %v2303_v23 = vld [vmem:[#allocation2 + $0x23] sm:$0xff]  ;;  %v3894_v48 = vld [vmem:[#allocation20_spill] sm:$0xff] }
 0x27d   :  { %2963 = vmatpush3.msra.mxu1 %v1868_v50  ;;  %2959 = vmatprep.mubr.msk.f32.mxu1 %vm175_vm0, %v1756_v37  ;;  %v2305_v50 = vmul.f32 %v3685_v5, %v3889_v56  ;;  %v2528_v22 = vld [vmem:[%s3828_s6 + $0x40] sm:$0xff]  ;;  %v2307_v16 = vmul.f32 %v2303_v23, %v3891_v9  ;;  %v3892_v37 = vld [vmem:[#allocation19_spill] sm:$0xff]  ;;  %v3899_v59 = vld [vmem:[#allocation24_spill] sm:$0xff]  ;;  %v2640_v9 = vlaneseq }
 0x27e   :  { %2970 = vmatprep.subr.mxu1 %v1978_v41  ;;  %v3893_v5 = vld [vmem:[#allocation18_spill] sm:$0xff] }
 0x27f   :  { %v2415_v60 = vmul.f32 %v3698_v13, %v3893_v5  ;;  %v2525_v13 = vmul.f32 %v3718_v49, %v3897_v57 }
 0x280   :  { %2960 = vmatmul.mubr.msk.f32.gmra.mrb[2].mxu1 %vm175_vm0, %v1757_v52  ;;  %v2416_v52 = vmul.f32 %v3705_v31, %v3894_v48 }
 0x281   :  { %2964 = vmatprep.mubr.msk.f32.mxu1 %vm175_vm0, %v1864_v45  ;;  %v2413_v45 = vld [vmem:[#allocation2 + $0x24] sm:$0xff] }
 0x284   :  { %2965 = vmatmul.mubr.msk.f32.vlgmr.msra.gmra.mrb[0].mxu1 %vm175_vm0, %v1865_v34  ;;  %v3895_v34 = vld [vmem:[#allocation22_spill] sm:$0xff] }
 0x285   :  { %2971 = vmatpush3.msra.mxu1 %v1978_v41  ;;  %2967 = vmatprep.mubr.msk.f32.mxu1 %vm175_vm0, %v1866_v18  ;;  %v2414_v41 = vmul.f32 %v3695_v15, %v3892_v37  ;;  %v2417_v18 = vmul.f32 %v2413_v45, %v3895_v34 }
 0x286   :  { %2978 = vmatprep.subr.mxu1 %v2088_v53 }
 0x288   :  { %2968 = vmatmul.mubr.msk.f32.gmra.mrb[2].mxu1 %vm175_vm0, %v1867_v29  ;;  %v3898_v29 = vld [vmem:[#allocation25_spill] sm:$0xff] }
 0x289   :  { %2972 = vmatprep.mubr.msk.f32.mxu1 %vm175_vm0, %v1974_v63  ;;  %v2526_v31 = vmul.f32 %v3725_v2, %v3898_v29  ;;  %v2523_v63 = vld [vmem:[#allocation2 + $0x25] sm:$0xff] }
 0x28a   :  { %v2527_v28 = vmul.f32 %v2523_v63, %v3899_v59  ;;  %v2639_v2 = vld [vmem:[%s3831_s8 + $0x8] sm:$0xff] }
 0x28c   :  { %2973 = vmatmul.mubr.msk.f32.vlgmr.msra.gmra.mrb[0].mxu1 %vm175_vm0, %v1975_v42 }
 0x28d   :  { %2979 = vmatpush3.msra.mxu1 %v2088_v53  ;;  %2975 = vmatprep.mubr.msk.f32.mxu1 %vm175_vm0, %v1976_v27  ;;  %v3896_v53 = vld [vmem:[#allocation21_spill] sm:$0xff] }
 0x28e   :  { %2986 = vmatprep.subr.mxu1 %v2198_v11  ;;  %v2524_v15 = vmul.f32 %v3715_v35, %v3896_v53  ;;  %v2746_v35 = vld [vmem:[%s3830_s7] ss:$0 sm:$0xff] }
 0x290   :  { %2976 = vmatmul.mubr.msk.f32.gmra.mrb[2].mxu1 %vm175_vm0, %v1977_v26  ;;  %v2638_v26 = vld [vmem:[%s3831_s8] sm:$0xff] }
 0x291   :  { %2980 = vmatprep.mubr.msk.f32.mxu1 %vm175_vm0, %v2084_v62 }
 0x294   :  { %2981 = vmatmul.mubr.msk.f32.vlgmr.msra.gmra.mrb[0].mxu1 %vm175_vm0, %v2085_v33 }
 0x295   :  { %2987 = vmatpush3.msra.mxu1 %v2198_v11  ;;  %2983 = vmatprep.mubr.msk.f32.mxu1 %vm175_vm0, %v2086_v54 }
 0x296   :  { %2994 = vmatprep.subr.mxu1 %v2308_v46 }
 0x298   :  { %2984 = vmatmul.mubr.msk.f32.gmra.mrb[2].mxu1 %vm175_vm0, %v2087_v40 }
 0x299   :  { %2988 = vmatprep.mubr.msk.f32.mxu1 %vm175_vm0, %v2194_v61 }
 0x29c   :  { %2989 = vmatmul.mubr.msk.f32.vlgmr.msra.gmra.mrb[0].mxu1 %vm175_vm0, %v2195_v10  ;;  %v15_v10 = vstv %s3832_s9 }
 0x29d   :  { %2995 = vmatpush3.msra.mxu1 %v2308_v46  ;;  %2991 = vmatprep.mubr.msk.f32.mxu1 %vm175_vm0, %v2196_v17  ;;  %16 = vst [vmem:[#allocation3] sm:$0x1] %v15_v10 }
 0x29e   :  { %3002 = vmatprep.subr.mxu1 %v2418_v44 }
 0x2a0   :  { %2992 = vmatmul.mubr.msk.f32.gmra.mrb[2].mxu1 %vm175_vm0, %v2197_v21 }
 0x2a1   :  { %2996 = vmatprep.mubr.msk.f32.mxu1 %vm175_vm0, %v2304_v8 }
 0x2a4   :  { %2997 = vmatmul.mubr.msk.f32.vlgmr.msra.gmra.mrb[0].mxu1 %vm175_vm0, %v2305_v50  ;;  %v2783_v48 = vld [vmem:[#allocation3] ss:$0 sm:$0xff] }
 0x2a5   :  { %3003 = vmatpush3.msra.mxu1 %v2418_v44  ;;  %2999 = vmatprep.mubr.msk.f32.mxu1 %vm175_vm0, %v2306_v55 }
 0x2a6   :  { %3010 = vmatprep.subr.mxu1 %v2528_v22 }
 0x2a8   :  { %3000 = vmatmul.mubr.msk.f32.gmra.mrb[2].mxu1 %vm175_vm0, %v2307_v16  ;;  %v2641_v16 = vshrl.u32 %v2640_v9, 7 }
 0x2a9   :  { %3004 = vmatprep.mubr.msk.f32.mxu1 %vm175_vm0, %v2414_v41 }
 0x2aa   :  { %vm2656_vm5 = vcmp.eq.s32.totalorder %v2641_v16, 0  ;;  %vm2674_vm6 = vcmp.eq.s32.totalorder %v2641_v16, 1 }
 0x2ac   :  { %3005 = vmatmul.mubr.msk.f32.vlgmr.msra.gmra.mrb[0].mxu1 %vm175_vm0, %v2415_v60 }
 0x2ad   :  { %3011 = vmatpush3.msra.mxu1 %v2528_v22  ;;  %3007 = vmatprep.mubr.msk.f32.mxu1 %vm175_vm0, %v2416_v52 }
 0x2b0   :  { %3008 = vmatmul.mubr.msk.f32.gmra.mrb[2].mxu1 %vm175_vm0, %v2417_v18 }
 0x2b1   :  { %3012 = vmatprep.mubr.msk.f32.mxu1 %vm175_vm0, %v2524_v15 }
 0x2b4   :  { %3013 = vmatmul.mubr.msk.f32.vlgmr.msra.gmra.mrb[0].mxu1 %vm175_vm0, %v2525_v13 }
 0x2b5   :  { %3015 = vmatprep.mubr.msk.f32.mxu1 %vm175_vm0, %v2526_v31 }
 0x2b8   :  { %3016 = vmatmul.mubr.msk.f32.gmra.mrb[2].mxu1 %vm175_vm0, %v2527_v28 }
 0x387   :  { %v3014_v42 = vpop.f32.mrb[0].mxu1 }
 0x388   :  { %v3054_v6 = vadd.f32 %v3014_v42, %v2746_v35  ;;  %v2607_v27 = vpop.f32.mrb[1].mxu1 }
 0x389   :  { %v3055_v49 = vadd.f32 %v2746_v35, %v2607_v27 }
 0x38a   :  { %v2631_v14 = vmul.f32 0.2, %v3054_v6 }
 0x38b   :  { %v2630_v11 = vmul.f32 0.2, %v3055_v49  ;;  %v3017_v20 = vpop.f32.mrb[2].mxu1 }
 0x38c   :  { %v2635_v39 = vmax.f32 %v3054_v6, %v2631_v14  ;;  %v3056_v30 = vadd.f32 %v3017_v20, %v2746_v35  ;;  %v2617_v62 = vpop.f32.mrb[3].mxu1 }
 0x38d   :  { %v2634_v24 = vmax.f32 %v3055_v49, %v2630_v11  ;;  %v3057_v38 = vadd.f32 %v2746_v35, %v2617_v62 }
 0x38e   :  { %v2643_v43 = vmul.f32 %v2639_v2, %v2635_v39  ;;  %v2633_v33 = vmul.f32 0.2, %v3056_v30 }
 0x38f   :  { %v2642_v51 = vmul.f32 %v2638_v26, %v2634_v24  ;;  %v2632_v54 = vmul.f32 0.2, %v3057_v38 }
 0x390   :  { %v2637_v19 = vmax.f32 %v3056_v30, %v2633_v33  ;;  %v2645_v46 = vsel %vm175_vm0, %v2643_v43, 0.0 }
 0x391   :  { %v2636_v47 = vmax.f32 %v3057_v38, %v2632_v54  ;;  %v2644_v25 = vsel %vm175_vm0, %v2642_v51, 0.0 }
 0x392   :  { %v2646_v40 = vadd.f32 %v2645_v46, %v2644_v25  ;;  %v2661_v4 = vmul.f32 %v2639_v2, %v2637_v19 }
 0x393   :  { %v2660_v61 = vmul.f32 %v2638_v26, %v2636_v47 }
 0x394   :  { %2647 = vadd.xlane.f32.xlu1 %v2646_v40  ;;  %v2663_v36 = vsel %vm175_vm0, %v2661_v4, 0.0 }
 0x395   :  { %v2662_v7 = vsel %vm175_vm0, %v2660_v61, 0.0 }
 0x396   :  { %v2664_v12 = vadd.f32 %v2663_v36, %v2662_v7 }
 0x398   :  { %2665 = vadd.xlane.f32.xlu0 %v2664_v12 }
 0x421   :  { %v2648_v58 = vpop.xlane.xlu1 %2647 }
 0x422   :  { %v2649_v17 = vrot.slane %v2648_v58, 4 }
 0x424   :  { %v2650_v0 = vadd.f32 %v2649_v17, %v2648_v58 }
 0x425   :  { %v2666_v44 = vpop.xlane.xlu0 %2665 }
 0x426   :  { %v2651_v1 = vrot.slane %v2650_v0, 2  ;;  %v2667_v21 = vrot.slane %v2666_v44, 4 }
 0x428   :  { %v2652_v32 = vadd.f32 %v2651_v1, %v2650_v0  ;;  %v2668_v8 = vadd.f32 %v2667_v21, %v2666_v44 }
 0x42a   :  { %v2669_v56 = vrot.slane %v2668_v8, 2  ;;  %v2653_v50 = vrot.slane %v2652_v32, 1 }
 0x42c   :  { %v2654_v3 = vadd.f32 %v2653_v50, %v2652_v32  ;;  %v2670_v55 = vadd.f32 %v2669_v56, %v2668_v8 }
 0x42e   :  { %3124 = vpush %v2654_v3  ;;  %v2671_v23 = vrot.slane %v2670_v55, 1 }
 0x430   :  { %v2672_v22 = vadd.f32 %v2671_v23, %v2670_v55 }
 0x432   :  { %3126 = vpush %v2672_v22 }
 0x45f   :  { %s3125_s9 = spop %3124 }
 0x460   :  { %v2657_v37 = vstv %s3125_s9 }
 0x461   :  { %v2658_v5 = vsel %vm2656_vm5, %v2657_v37, 0.0 }
 0x463   :  { %s3127_s0 = spop %3126 }
 0x464   :  { %v2675_v41 = vstv %s3127_s0 }
 0x465   :  { %v2676_v60 = vsel %vm2674_vm6, %v2675_v41, 0.0 }
 0x466   :  { %v2677_v52 = vadd.f32 %v2676_v60, %v2658_v5 }
 0x468   :  { %v2685_v45 = vadd.f32 %v2783_v48, %v2677_v52 }
 0x46a   :  { %2688 = vperm.xlu0 %3188, %v2685_v45  }
 0x4e9   :  { %v2689_v34 = vpop.permute.xlu0 %2688 }
 0x4ea   :  { %2691 = vst [vmem:[%s3833_s10] sm:$0x3] %v2689_v34 }

</bundles_post_ra>
